<compile_context>
chip_gen: v7x
topology: tpu7x:2x2x1
jax: 0.10.0
libtpu: 0.0.40
codegen_flags: <defaults>
</compile_context>

<pallas_src>
import functools

import jax
import jax.numpy as jnp
from jax.experimental import pallas as pl
from jax.experimental.pallas import tpu as pltpu


# ----------------------------------------------------------------------------
# Kernel
# ----------------------------------------------------------------------------
def _mlp_kernel(x_ref, w0_ref, b0_ref, wh_ref, bh_ref, wo_ref, bo_ref, o_ref,
                *, h_layers):
    """One batch tile: x[TM, Cin] -> o[TM, Cout], all layers fused.

    Weights arrive pre-transposed to [in, out] and pre-cast to the MXU operand
    dtype (bf16 by default). Biases arrive as [1, out] rows: b0/bh in the
    activation (VPU) dtype, bo in f32. All matmuls accumulate in f32.
    """
    cdt = w0_ref.dtype          # MXU operand dtype (bf16 on v5e/v6e/v7x)
    adt = b0_ref.dtype          # bias-add / ReLU dtype (f32 on v5e, bf16 on v6e/v7x)

    # Layer 0: [TM, Cin] @ [Cin, H] -> [TM, H], f32 accumulation on the MXU.
    # TODO(synk): if bundle dumps ever show the MXU (not DMA / step overhead) as
    # the per-step binder, replace this K=Cin(=4) MXU pass with Cin VPU
    # broadcast-FMAs; the kernel is currently overhead/DMA bound so it is moot.
    h = jnp.dot(x_ref[...].astype(cdt), w0_ref[...],
                preferred_element_type=jnp.float32)
    h = jnp.maximum(h.astype(adt) + b0_ref[...], 0).astype(cdt)

    # Hidden blocks, statically unrolled (h_layers is small).
    for l in range(h_layers):
        h = jnp.dot(h, wh_ref[l], preferred_element_type=jnp.float32)
        h = jnp.maximum(h.astype(adt) + bh_ref[l], 0).astype(cdt)

    # Output layer: [TM, H] @ [H, Cout] -> [TM, Cout]; f32 bias-add, no activation.
    out = jnp.dot(h, wo_ref[...], preferred_element_type=jnp.float32)
    o_ref[...] = (out + bo_ref[...]).astype(o_ref.dtype)


# ----------------------------------------------------------------------------
# Wrapper / setup helpers
# ----------------------------------------------------------------------------
def _default_act_dtype():
    """bf16 bias-add/ReLU on chips with a bf16 VALU (v6e/v7x), else f32 (v5e/v4/...)."""
    try:
        kind = jax.devices()[0].device_kind.lower()
    except Exception:
        return jnp.float32
    return jnp.bfloat16 if any(t in kind for t in ("v6", "v7", "7x")) else jnp.float32


def _pick_tile_m(B):
    """Batch tile: ~4 even grid steps (>=2 pipelined steps per v7x TensorCore),
    each as large as possible (amortise ~0.35us/step), capped at 1024 rows.
    VMEM is never the constraint here (~70 KB resident weights + tiny I/O tiles)."""
    tm = min(1024, max(128, pl.cdiv(B, 4)))
    tm = pl.cdiv(tm, 128) * 128          # DMA / layout friendly multiple of 128
    if tm >= B:
        return B                          # single full-extent block is always legal
    return tm


def prepare_params(params, *, compute_dtype=jnp.bfloat16, act_dtype=None):
    """One-time preprocessing (hoisted out of the hot path per review):
    transpose weights to [in, out], cast matmul operands to `compute_dtype`
    (bf16 by default; pass jnp.float32 for a full-precision path), biases to
    the activation dtype, final bias stays f32."""
    if act_dtype is None:
        act_dtype = _default_act_dtype()
    return {
        "w0": jnp.asarray(params["w_in"]).T.astype(compute_dtype),                    # [Cin, H]
        "b0": jnp.asarray(params["b_in"]).astype(act_dtype)[None, :],                 # [1, H]
        "wh": jnp.transpose(jnp.asarray(params["w_h"]), (0, 2, 1)).astype(compute_dtype),  # [L, H, H]
        "bh": jnp.asarray(params["b_h"]).astype(act_dtype)[:, None, :],               # [L, 1, H]
        "wo": jnp.asarray(params["w_out"]).T.astype(compute_dtype),                   # [H, Cout]
        "bo": jnp.asarray(params["b_out"]).astype(jnp.float32)[None, :],              # [1, Cout]
    }


def mlp_pallas(x, prepared, *, tile_m=None):
    """x: [B, Cin] float32, prepared: output of prepare_params. Returns [B, Cout] f32."""
    w0, b0 = prepared["w0"], prepared["b0"]
    wh, bh = prepared["wh"], prepared["bh"]
    wo, bo = prepared["wo"], prepared["bo"]

    B, Cin = x.shape
    H = w0.shape[1]
    L = wh.shape[0]
    Cout = wo.shape[1]

    tm = _pick_tile_m(B) if tile_m is None else min(tile_m, B)
    grid = (pl.cdiv(B, tm),)

    flops = 2 * B * (Cin * H + L * H * H + H * Cout)
    bytes_accessed = (
        B * Cin * x.dtype.itemsize
        + w0.size * w0.dtype.itemsize
        + wh.size * wh.dtype.itemsize
        + wo.size * wo.dtype.itemsize
        + b0.size * b0.dtype.itemsize
        + bh.size * bh.dtype.itemsize
        + bo.size * bo.dtype.itemsize
        + B * Cout * 4
    )

    kernel = functools.partial(_mlp_kernel, h_layers=L)

    return pl.pallas_call(
        kernel,
        out_shape=jax.ShapeDtypeStruct((B, Cout), jnp.float32),
        grid_spec=pltpu.PrefetchScalarGridSpec(
            num_scalar_prefetch=0,
            grid=grid,
            in_specs=[
                # batch tile of the input, natural [B, Cin] layout (contiguous DMA)
                pl.BlockSpec((tm, Cin), lambda i: (i, 0)),
                # small weights/biases: constant block index -> DMA'd once, VMEM-resident
                pl.BlockSpec((Cin, H), lambda i: (0, 0)),
                pl.BlockSpec((1, H), lambda i: (0, 0)),
                pl.BlockSpec((L, H, H), lambda i: (0, 0, 0)),
                pl.BlockSpec((L, 1, H), lambda i: (0, 0, 0)),
                pl.BlockSpec((H, Cout), lambda i: (0, 0)),
                pl.BlockSpec((1, Cout), lambda i: (0, 0)),
            ],
            out_specs=pl.BlockSpec((tm, Cout), lambda i: (i, 0)),
        ),
        compiler_params=pltpu.CompilerParams(
            dimension_semantics=("parallel",),
        ),
        cost_estimate=pl.CostEstimate(
            flops=flops, transcendentals=0, bytes_accessed=bytes_accessed),
    )(x, w0, b0, wh, bh, wo, bo)


# ----------------------------------------------------------------------------
# Reference + synthetic init (PyTorch nn.Linear layout: W [out, in], b [out])
# ----------------------------------------------------------------------------
def init_params(key, in_channels, out_channels, h_channels=64, h_layers=4,
                dtype=jnp.float32):
    ks = jax.random.split(key, 2 + h_layers)

    def lin(k, fan_in, fan_out):
        bound = float(fan_in) ** -0.5
        kw, kb = jax.random.split(k)
        w = jax.random.uniform(kw, (fan_out, fan_in), dtype, -bound, bound)
        b = jax.random.uniform(kb, (fan_out,), dtype, -bound, bound)
        return w, b

    w_in, b_in = lin(ks[0], in_channels, h_channels)
    hidden = [lin(ks[2 + l], h_channels, h_channels) for l in range(h_layers)]
    w_h = jnp.stack([w for w, _ in hidden])
    b_h = jnp.stack([b for _, b in hidden])
    w_out, b_out = lin(ks[1], h_channels, out_channels)
    return {"w_in": w_in, "b_in": b_in, "w_h": w_h, "b_h": b_h,
            "w_out": w_out, "b_out": b_out}


def mlp_reference(x, params):
    """Pure-JAX f32 reference mirroring the PyTorch forward exactly (x @ W.T + b)."""
    h = jnp.maximum(x @ params["w_in"].T + params["b_in"], 0.0)
    for l in range(params["w_h"].shape[0]):
        h = jnp.maximum(h @ params["w_h"][l].T + params["b_h"][l], 0.0)
    return h @ params["w_out"].T + params["b_out"]


# ----------------------------------------------------------------------------
# Demo / self-check
# ----------------------------------------------------------------------------
if __name__ == "__main__":
    key = jax.random.PRNGKey(0)
    k_param, k_x, k_x2 = jax.random.split(key, 3)

    in_channels, out_channels = 4, 2
    h_channels, h_layers = 64, 4
    batch = 1024               # tile_m=256 -> 4 grid steps (2 per v7x TensorCore)

    params = init_params(k_param, in_channels, out_channels, h_channels, h_layers)

    # One-time param prep (bf16 MXU operands, device-appropriate activation dtype).
    prepped = prepare_params(params)
    mlp_fn = jax.jit(mlp_pallas)

    x = jax.random.normal(k_x, (batch, in_channels), jnp.float32)
    out = jax.block_until_ready(mlp_fn(x, prepped))

    ref = mlp_reference(x, params)
    assert out.shape == (batch, out_channels)
    # bf16 matmul operands (and possibly bf16 bias/ReLU on v6e/v7x) with f32
    # accumulation: tolerance loosened vs the pure-f32 reference.
    max_err = float(jnp.max(jnp.abs(out - ref)))
    mean_err = float(jnp.mean(jnp.abs(out - ref)))
    assert max_err < 1.2e-1, f"mismatch vs reference: max abs err {max_err}"
    assert mean_err < 2e-2, f"mismatch vs reference: mean abs err {mean_err}"

    # Ragged-B test (B % tile_m != 0) with the always-f32 activation path.
    batch2 = 1000
    x2 = jax.random.normal(k_x2, (batch2, in_channels), jnp.float32)
    prepped_f32act = prepare_params(params, act_dtype=jnp.float32)
    out2 = jax.block_until_ready(mlp_fn(x2, prepped_f32act))
    ref2 = mlp_reference(x2, params)
    assert out2.shape == (batch2, out_channels)
    max_err2 = float(jnp.max(jnp.abs(out2 - ref2)))
    assert max_err2 < 1.2e-1, f"ragged-B mismatch vs reference: max abs err {max_err2}"

    print("KERNEL_OK")
</pallas_src>

<mosaic_0001>
module attributes {stable_mosaic.version = 11 : i64} {
  func.func @_mlp_kernel(%arg0: i32, %arg1: memref<256x4xf32, #tpu.memory_space<vmem>>, %arg2: memref<4x64xbf16, #tpu.memory_space<vmem>>, %arg3: memref<1x64xf32, #tpu.memory_space<vmem>>, %arg4: memref<4x64x64xbf16, #tpu.memory_space<vmem>>, %arg5: memref<4x1x64xf32, #tpu.memory_space<vmem>>, %arg6: memref<64x2xbf16, #tpu.memory_space<vmem>>, %arg7: memref<1x2xf32, #tpu.memory_space<vmem>>, %arg8: memref<256x2xf32, #tpu.memory_space<vmem>>) attributes {dimension_semantics = [#tpu.dimension_semantics<parallel>], iteration_bounds = array<i64: 4>, scalar_prefetch = 0 : i64, scratch_operands = 0 : i64, tpu.core_type = #tpu.core_type<tc>, window_params = [{transform_indices = @transform_0, window_bounds = array<i64: 256, 4>}, {pipeline_mode = #tpu.pipeline_mode<synchronous>, transform_indices = @transform_1, window_bounds = array<i64: 4, 64>}, {pipeline_mode = #tpu.pipeline_mode<synchronous>, transform_indices = @transform_2, window_bounds = array<i64: 1, 64>}, {pipeline_mode = #tpu.pipeline_mode<synchronous>, transform_indices = @transform_3, window_bounds = array<i64: 4, 64, 64>}, {pipeline_mode = #tpu.pipeline_mode<synchronous>, transform_indices = @transform_4, window_bounds = array<i64: 4, 1, 64>}, {pipeline_mode = #tpu.pipeline_mode<synchronous>, transform_indices = @transform_5, window_bounds = array<i64: 64, 2>}, {pipeline_mode = #tpu.pipeline_mode<synchronous>, transform_indices = @transform_6, window_bounds = array<i64: 1, 2>}, {transform_indices = @transform_7, window_bounds = array<i64: 256, 2>}]} {
    %c0 = arith.constant 0 : index
    %c0_0 = arith.constant 0 : index
    %0 = vector.load %arg1[%c0, %c0_0] : memref<256x4xf32, #tpu.memory_space<vmem>>, vector<256x4xf32>
    %1 = arith.truncf %0 : vector<256x4xf32> to vector<256x4xbf16>
    %c0_1 = arith.constant 0 : index
    %c0_2 = arith.constant 0 : index
    %2 = vector.load %arg2[%c0_1, %c0_2] : memref<4x64xbf16, #tpu.memory_space<vmem>>, vector<4x64xbf16>
    %cst = arith.constant dense<0.000000e+00> : vector<256x64xf32>
    %3 = tpu.matmul %1, %2, %cst {dimension_numbers = #tpu.dot_dimension_numbers<[1], [0], [0], [1], [0, 0, 1, 1], [], []>} : vector<256x4xbf16>, vector<4x64xbf16>, vector<256x64xf32> -> vector<256x64xf32>
    %c0_3 = arith.constant 0 : index
    %c0_4 = arith.constant 0 : index
    %4 = vector.load %arg3[%c0_3, %c0_4] : memref<1x64xf32, #tpu.memory_space<vmem>>, vector<1x64xf32>
    %5 = vector.broadcast %4 : vector<1x64xf32> to vector<256x64xf32>
    %6 = arith.addf %3, %5 : vector<256x64xf32>
    %cst_5 = arith.constant 0.000000e+00 : f32
    %7 = vector.broadcast %cst_5 : f32 to vector<256x64xf32>
    %8 = arith.maximumf %6, %7 : vector<256x64xf32>
    %9 = arith.truncf %8 : vector<256x64xf32> to vector<256x64xbf16>
    %c0_6 = arith.constant 0 : index
    %c0_7 = arith.constant 0 : index
    %c0_8 = arith.constant 0 : index
    %10 = vector.load %arg4[%c0_6, %c0_7, %c0_8] : memref<4x64x64xbf16, #tpu.memory_space<vmem>>, vector<1x64x64xbf16>
    %11 = vector.shape_cast %10 : vector<1x64x64xbf16> to vector<64x64xbf16>
    %cst_9 = arith.constant dense<0.000000e+00> : vector<256x64xf32>
    %12 = tpu.matmul %9, %11, %cst_9 {dimension_numbers = #tpu.dot_dimension_numbers<[1], [0], [0], [1], [0, 0, 1, 1], [], []>} : vector<256x64xbf16>, vector<64x64xbf16>, vector<256x64xf32> -> vector<256x64xf32>
    %c0_10 = arith.constant 0 : index
    %c0_11 = arith.constant 0 : index
    %c0_12 = arith.constant 0 : index
    %13 = vector.load %arg5[%c0_10, %c0_11, %c0_12] : memref<4x1x64xf32, #tpu.memory_space<vmem>>, vector<1x1x64xf32>
    %14 = vector.shape_cast %13 : vector<1x1x64xf32> to vector<1x64xf32>
    %15 = vector.broadcast %14 : vector<1x64xf32> to vector<256x64xf32>
    %16 = arith.addf %12, %15 : vector<256x64xf32>
    %cst_13 = arith.constant 0.000000e+00 : f32
    %17 = vector.broadcast %cst_13 : f32 to vector<256x64xf32>
    %18 = arith.maximumf %16, %17 : vector<256x64xf32>
    %19 = arith.truncf %18 : vector<256x64xf32> to vector<256x64xbf16>
    %c1 = arith.constant 1 : index
    %c0_14 = arith.constant 0 : index
    %c0_15 = arith.constant 0 : index
    %20 = vector.load %arg4[%c1, %c0_14, %c0_15] : memref<4x64x64xbf16, #tpu.memory_space<vmem>>, vector<1x64x64xbf16>
    %21 = vector.shape_cast %20 : vector<1x64x64xbf16> to vector<64x64xbf16>
    %cst_16 = arith.constant dense<0.000000e+00> : vector<256x64xf32>
    %22 = tpu.matmul %19, %21, %cst_16 {dimension_numbers = #tpu.dot_dimension_numbers<[1], [0], [0], [1], [0, 0, 1, 1], [], []>} : vector<256x64xbf16>, vector<64x64xbf16>, vector<256x64xf32> -> vector<256x64xf32>
    %c1_17 = arith.constant 1 : index
    %c0_18 = arith.constant 0 : index
    %c0_19 = arith.constant 0 : index
    %23 = vector.load %arg5[%c1_17, %c0_18, %c0_19] : memref<4x1x64xf32, #tpu.memory_space<vmem>>, vector<1x1x64xf32>
    %24 = vector.shape_cast %23 : vector<1x1x64xf32> to vector<1x64xf32>
    %25 = vector.broadcast %24 : vector<1x64xf32> to vector<256x64xf32>
    %26 = arith.addf %22, %25 : vector<256x64xf32>
    %cst_20 = arith.constant 0.000000e+00 : f32
    %27 = vector.broadcast %cst_20 : f32 to vector<256x64xf32>
    %28 = arith.maximumf %26, %27 : vector<256x64xf32>
    %29 = arith.truncf %28 : vector<256x64xf32> to vector<256x64xbf16>
    %c2 = arith.constant 2 : index
    %c0_21 = arith.constant 0 : index
    %c0_22 = arith.constant 0 : index
    %30 = vector.load %arg4[%c2, %c0_21, %c0_22] : memref<4x64x64xbf16, #tpu.memory_space<vmem>>, vector<1x64x64xbf16>
    %31 = vector.shape_cast %30 : vector<1x64x64xbf16> to vector<64x64xbf16>
    %cst_23 = arith.constant dense<0.000000e+00> : vector<256x64xf32>
    %32 = tpu.matmul %29, %31, %cst_23 {dimension_numbers = #tpu.dot_dimension_numbers<[1], [0], [0], [1], [0, 0, 1, 1], [], []>} : vector<256x64xbf16>, vector<64x64xbf16>, vector<256x64xf32> -> vector<256x64xf32>
    %c2_24 = arith.constant 2 : index
    %c0_25 = arith.constant 0 : index
    %c0_26 = arith.constant 0 : index
    %33 = vector.load %arg5[%c2_24, %c0_25, %c0_26] : memref<4x1x64xf32, #tpu.memory_space<vmem>>, vector<1x1x64xf32>
    %34 = vector.shape_cast %33 : vector<1x1x64xf32> to vector<1x64xf32>
    %35 = vector.broadcast %34 : vector<1x64xf32> to vector<256x64xf32>
    %36 = arith.addf %32, %35 : vector<256x64xf32>
    %cst_27 = arith.constant 0.000000e+00 : f32
    %37 = vector.broadcast %cst_27 : f32 to vector<256x64xf32>
    %38 = arith.maximumf %36, %37 : vector<256x64xf32>
    %39 = arith.truncf %38 : vector<256x64xf32> to vector<256x64xbf16>
    %c3 = arith.constant 3 : index
    %c0_28 = arith.constant 0 : index
    %c0_29 = arith.constant 0 : index
    %40 = vector.load %arg4[%c3, %c0_28, %c0_29] : memref<4x64x64xbf16, #tpu.memory_space<vmem>>, vector<1x64x64xbf16>
    %41 = vector.shape_cast %40 : vector<1x64x64xbf16> to vector<64x64xbf16>
    %cst_30 = arith.constant dense<0.000000e+00> : vector<256x64xf32>
    %42 = tpu.matmul %39, %41, %cst_30 {dimension_numbers = #tpu.dot_dimension_numbers<[1], [0], [0], [1], [0, 0, 1, 1], [], []>} : vector<256x64xbf16>, vector<64x64xbf16>, vector<256x64xf32> -> vector<256x64xf32>
    %c3_31 = arith.constant 3 : index
    %c0_32 = arith.constant 0 : index
    %c0_33 = arith.constant 0 : index
    %43 = vector.load %arg5[%c3_31, %c0_32, %c0_33] : memref<4x1x64xf32, #tpu.memory_space<vmem>>, vector<1x1x64xf32>
    %44 = vector.shape_cast %43 : vector<1x1x64xf32> to vector<1x64xf32>
    %45 = vector.broadcast %44 : vector<1x64xf32> to vector<256x64xf32>
    %46 = arith.addf %42, %45 : vector<256x64xf32>
    %cst_34 = arith.constant 0.000000e+00 : f32
    %47 = vector.broadcast %cst_34 : f32 to vector<256x64xf32>
    %48 = arith.maximumf %46, %47 : vector<256x64xf32>
    %49 = arith.truncf %48 : vector<256x64xf32> to vector<256x64xbf16>
    %c0_35 = arith.constant 0 : index
    %c0_36 = arith.constant 0 : index
    %50 = vector.load %arg6[%c0_35, %c0_36] : memref<64x2xbf16, #tpu.memory_space<vmem>>, vector<64x2xbf16>
    %cst_37 = arith.constant dense<0.000000e+00> : vector<256x2xf32>
    %51 = tpu.matmul %49, %50, %cst_37 {dimension_numbers = #tpu.dot_dimension_numbers<[1], [0], [0], [1], [0, 0, 1, 1], [], []>} : vector<256x64xbf16>, vector<64x2xbf16>, vector<256x2xf32> -> vector<256x2xf32>
    %c0_38 = arith.constant 0 : index
    %c0_39 = arith.constant 0 : index
    %52 = vector.load %arg7[%c0_38, %c0_39] : memref<1x2xf32, #tpu.memory_space<vmem>>, vector<1x2xf32>
    %53 = vector.broadcast %52 : vector<1x2xf32> to vector<256x2xf32>
    %54 = arith.addf %51, %53 : vector<256x2xf32>
    %c0_40 = arith.constant 0 : index
    %c0_41 = arith.constant 0 : index
    %55 = vector.load %arg8[%c0_40, %c0_41] : memref<256x2xf32, #tpu.memory_space<vmem>>, vector<256x2xf32>
    tpu.vector_store %arg8[%c0_40, %c0_41], %54 {strides = array<i32>} : memref<256x2xf32, #tpu.memory_space<vmem>>, vector<256x2xf32>,
    return
  }
  func.func @transform_0(%arg0: i32) -> (i32, i32) {
    %c0_i32 = arith.constant 0 : i32
    %c0_i32_0 = arith.constant 0 : i32
    return %arg0, %c0_i32 : i32, i32
  }
  func.func @transform_1(%arg0: i32) -> (i32, i32) {
    %c0_i32 = arith.constant 0 : i32
    %c0_i32_0 = arith.constant 0 : i32
    %c0_i32_1 = arith.constant 0 : i32
    return %c0_i32, %c0_i32_0 : i32, i32
  }
  func.func @transform_2(%arg0: i32) -> (i32, i32) {
    %c0_i32 = arith.constant 0 : i32
    %c0_i32_0 = arith.constant 0 : i32
    %c0_i32_1 = arith.constant 0 : i32
    return %c0_i32, %c0_i32_0 : i32, i32
  }
  func.func @transform_3(%arg0: i32) -> (i32, i32, i32) {
    %c0_i32 = arith.constant 0 : i32
    %c0_i32_0 = arith.constant 0 : i32
    %c0_i32_1 = arith.constant 0 : i32
    %c0_i32_2 = arith.constant 0 : i32
    return %c0_i32, %c0_i32_0, %c0_i32_1 : i32, i32, i32
  }
  func.func @transform_4(%arg0: i32) -> (i32, i32, i32) {
    %c0_i32 = arith.constant 0 : i32
    %c0_i32_0 = arith.constant 0 : i32
    %c0_i32_1 = arith.constant 0 : i32
    %c0_i32_2 = arith.constant 0 : i32
    return %c0_i32, %c0_i32_0, %c0_i32_1 : i32, i32, i32
  }
  func.func @transform_5(%arg0: i32) -> (i32, i32) {
    %c0_i32 = arith.constant 0 : i32
    %c0_i32_0 = arith.constant 0 : i32
    %c0_i32_1 = arith.constant 0 : i32
    return %c0_i32, %c0_i32_0 : i32, i32
  }
  func.func @transform_6(%arg0: i32) -> (i32, i32) {
    %c0_i32 = arith.constant 0 : i32
    %c0_i32_0 = arith.constant 0 : i32
    %c0_i32_1 = arith.constant 0 : i32
    return %c0_i32, %c0_i32_0 : i32, i32
  }
  func.func @transform_7(%arg0: i32) -> (i32, i32) {
    %c0_i32 = arith.constant 0 : i32
    %c0_i32_0 = arith.constant 0 : i32
    return %arg0, %c0_i32 : i32, i32
  }
}

</mosaic_0001>

<bundles_post_ra>
// kernel: mlp_pallas.1
= control target key start
LH: loop header
LB: loop body
LE: loop exit
PB: predicated region body
PF: predicated region fallthrough
CT: control target
= control target key end

     0   :  { %s2717_s24 = smov 0   ;;  %s3222_s0 = inlined_call_operand.vmem [shape: f32[1024,4], index: 0, kind: input, shape index: {}]   ;;  %s3223_s1 = inlined_call_operand.vmem [shape: bf16[4,64], index: 1, kind: input, shape index: {}]   ;;  %s3224_s2 = inlined_call_operand.vmem [shape: f32[1,64], index: 2, kind: input, shape index: {}]   ;;  %s3225_s3 = inlined_call_operand.vmem [shape: bf16[4,64,64], index: 3, kind: input, shape index: {}]   ;;  %s3226_s4 = inlined_call_operand.vmem [shape: f32[4,1,64], index: 4, kind: input, shape index: {}]   ;;  %s3227_s5 = inlined_call_operand.vmem [shape: bf16[64,2], index: 5, kind: input, shape index: {}]   ;;  %s3228_s6 = inlined_call_operand.vmem [shape: f32[1,2], index: 6, kind: input, shape index: {}]   ;;  %s3229_s7 = inlined_call_operand.vmem [shape: f32[1024,2], index: 7, kind: output, shape index: {}]  }
   0x1 LB: > { %s2129_s25 = sadd.s32 4294967295, %s2675_s24   ;;  %p2133_p0 = scmp.ge.s32.totalorder %s2675_s24, 1  ;;  %s2675_s24 = sphi %s2717_s24, %s17_s24  }
   0x2   : > { %p238_p1 = scmp.lt.s32.totalorder %s2675_s24, 5 }
   0x4   : > { %p239_p2 = pnand %p2133_p0, %p238_p1 }
   0x5   : > { %v331_v0 = vld [vmem:[%s3223_s1] sm:$0x3] (!%p239_p2)  ;;  %vm388_vm0 = vcmask (!%p239_p2), 1041408   ;;  %s2134_s28 = sshll.u32 (!%p239_p2), %s2129_s25, 5  ;;  %v2650_v3 = vld [vmem:[%s3225_s3 + $0x8] sm:$0xff] (!%p239_p2)   ;;  %vm339_vm1 = vcmask (!%p239_p2), 31744  }
   0x6   : > { %242 = sbr.rel (%p239_p2) target bundleno = 1404 (0x57c), region = 48  ;;  %v2649_v1 = vld [vmem:[%s3225_s3] sm:$0xff] (!%p239_p2)   ;;  %2640 = vmatprep.subr.msk.bf16.mxu0 (!%p239_p2), %vm388_vm0, %v331_v0  ;;  %v390_v2 = vsel (!%p239_p2), %vm388_vm0, %v331_v0, 0  ;;  %p271_p3 = scmp.lt.s32.totalorder (!%p239_p2), %s2134_s28, 127  ;;  %v2651_v52 = vld [vmem:[%s3225_s3 + $0x10] sm:$0xff] (!%p239_p2)   ;;  %v2652_v53 = vld [vmem:[%s3225_s3 + $0x18] sm:$0xff] (!%p239_p2)  }
   0x7   : > { %2407 = vmatpush3.bf16.msra.mxu0 (!%p239_p2), %v390_v2  ;;  %2440 = vmatprep.subr.bf16.mxu1 (!%p239_p2), %v2649_v1  ;;  %v2653_v54 = vld [vmem:[%s3225_s3 + $0x20] sm:$0xff] (!%p239_p2)   ;;  %v2654_v55 = vld [vmem:[%s3225_s3 + $0x28] sm:$0xff] (!%p239_p2)   ;;  %v2655_v56 = vld [vmem:[%s3225_s3 + $0x30] sm:$0xff] (!%p239_p2)   ;;  %vm640_vm2 = vcmask (!%p239_p2), 523264   ;;  %vm2040_vm3 = vcmask (!%p239_p2), 15360  }
   0x8   : > { %2441 = vmatpush3.bf16.msra.mxu1 (!%p239_p2), %v2649_v1  ;;  %2480 = vmatprep.subr.bf16.mxu0 (!%p239_p2), %v2653_v54  ;;  %v2656_v57 = vld [vmem:[%s3225_s3 + $0x38] sm:$0xff] (!%p239_p2)   ;;  %v2813_v58 = vld [vmem:[%s3224_s2] ss:$0 sm:$0xff] (!%p239_p2) }
   0x9   : > { %2442 = vmatprep.subr.bf16.mxu1 (!%p239_p2), %v2650_v3 }
   0xc   : > { %2443 = vmatpush3.bf16.msra.mxu1 (!%p239_p2), %v2650_v3 }
   0xd   : > { %s3231_s28 = smov (!%p271_p3, %s2134_s28), 127  ;;  %2444 = vmatprep.subr.bf16.mxu1 %v2651_v52 }
   0xe   : > { %s2135_s10 = sshll.u32 %s3231_s28, 3 }
   0xf   : > { %s2742_s13 = scalar_lea.vmem %s3222_s0, %s2135_s10  ;;  %s3121_s25 = scalar_lea.vmem %s3229_s7, %s2135_s10 }
  0x10   : > { %v283_v4 = vld [vmem:[%s2742_s13] sm:$0xff]  ;;  %v284_v5 = vld [vmem:[%s2742_s13 + $0x8] sm:$0xff]  ;;  %v285_v6 = vld [vmem:[%s2742_s13 + $0x10] sm:$0xff]  ;;  %2445 = vmatpush3.bf16.msra.mxu1 %v2651_v52 }
  0x11   : > { %v315_v7 = vpack.c.bf16 %v284_v5, %v283_v4  ;;  %v286_v8 = vld [vmem:[%s2742_s13 + $0x18] sm:$0xff]  ;;  %v287_v9 = vld [vmem:[%s2742_s13 + $0x20] sm:$0xff]  ;;  %v288_v10 = vld [vmem:[%s2742_s13 + $0x28] sm:$0xff]  ;;  %2446 = vmatprep.subr.bf16.mxu1 %v2652_v53 }
  0x12   : > { %v316_v11 = vpack.c.bf16 %v286_v8, %v285_v6  ;;  %v317_v12 = vpack.c.bf16 %v288_v10, %v287_v9  ;;  %v289_v13 = vld [vmem:[%s2742_s13 + $0x30] sm:$0xff]  ;;  %v290_v14 = vld [vmem:[%s2742_s13 + $0x38] sm:$0xff]  ;;  %v291_v15 = vld [vmem:[%s2742_s13 + $0x40] sm:$0xff] }
  0x13   : > { %2408 = vmatprep.mubr.msk.bf16.mxu0 %vm339_vm1, %v315_v7  ;;  %v292_v16 = vld [vmem:[%s2742_s13 + $0x48] sm:$0xff]  ;;  %v318_v17 = vpack.c.bf16 %v290_v14, %v289_v13  ;;  %v293_v19 = vld [vmem:[%s2742_s13 + $0x50] sm:$0xff]  ;;  %v294_v20 = vld [vmem:[%s2742_s13 + $0x58] sm:$0xff] }
  0x14   : > { %2409 = vmatmul.mubr.msk.bf16.vlgmr.msra.gmra.mrb[0].mxu0 %vm339_vm1, %v316_v11  ;;  %v319_v18 = vpack.c.bf16 %v292_v16, %v291_v15  ;;  %v295_v21 = vld [vmem:[%s2742_s13 + $0x60] sm:$0xff]  ;;  %v296_v22 = vld [vmem:[%s2742_s13 + $0x68] sm:$0xff]  ;;  %v320_v23 = vpack.c.bf16 %v294_v20, %v293_v19  ;;  %v297_v25 = vld [vmem:[%s2742_s13 + $0x70] sm:$0xff]  ;;  %2447 = vmatpush3.bf16.msra.mxu1 %v2652_v53 }
  0x15   : > { %2412 = vmatprep.mubr.msk.bf16.mxu0 %vm339_vm1, %v317_v12  ;;  %v321_v24 = vpack.c.bf16 %v296_v22, %v295_v21  ;;  %v298_v26 = vld [vmem:[%s2742_s13 + $0x78] sm:$0xff]  ;;  %v299_v27 = vld [vmem:[%s2742_s13 + $0x80] sm:$0xff]  ;;  %v300_v28 = vld [vmem:[%s2742_s13 + $0x88] sm:$0xff]  ;;  %2481 = vmatpush3.bf16.msra.mxu0 %v2653_v54 }
  0x16   : > { %v322_v29 = vpack.c.bf16 %v298_v26, %v297_v25  ;;  %v323_v30 = vpack.c.bf16 %v300_v28, %v299_v27  ;;  %v301_v31 = vld [vmem:[%s2742_s13 + $0x90] sm:$0xff]  ;;  %v302_v32 = vld [vmem:[%s2742_s13 + $0x98] sm:$0xff]  ;;  %v303_v33 = vld [vmem:[%s2742_s13 + $0xa0] sm:$0xff]  ;;  %2482 = vmatprep.subr.bf16.mxu0 %v2654_v55 }
  0x17   : > { %v304_v34 = vld [vmem:[%s2742_s13 + $0xa8] sm:$0xff]  ;;  %v324_v35 = vpack.c.bf16 %v302_v32, %v301_v31  ;;  %v305_v37 = vld [vmem:[%s2742_s13 + $0xb0] sm:$0xff]  ;;  %v306_v38 = vld [vmem:[%s2742_s13 + $0xb8] sm:$0xff] }
  0x18   : > { %v325_v36 = vpack.c.bf16 %v304_v34, %v303_v33  ;;  %v307_v39 = vld [vmem:[%s2742_s13 + $0xc0] sm:$0xff]  ;;  %v308_v40 = vld [vmem:[%s2742_s13 + $0xc8] sm:$0xff]  ;;  %v326_v41 = vpack.c.bf16 %v306_v38, %v305_v37  ;;  %v309_v43 = vld [vmem:[%s2742_s13 + $0xd0] sm:$0xff] }
  0x19   : > { %v327_v42 = vpack.c.bf16 %v308_v40, %v307_v39  ;;  %v310_v44 = vld [vmem:[%s2742_s13 + $0xd8] sm:$0xff]  ;;  %v311_v45 = vld [vmem:[%s2742_s13 + $0xe0] sm:$0xff]  ;;  %v312_v46 = vld [vmem:[%s2742_s13 + $0xe8] sm:$0xff]  ;;  %2483 = vmatpush3.bf16.msra.mxu0 %v2654_v55 }
  0x1a   : > { %v328_v47 = vpack.c.bf16 %v310_v44, %v309_v43  ;;  %v329_v48 = vpack.c.bf16 %v312_v46, %v311_v45  ;;  %v313_v49 = vld [vmem:[%s2742_s13 + $0xf0] sm:$0xff]  ;;  %v314_v50 = vld [vmem:[%s2742_s13 + $0xf8] sm:$0xff]  ;;  %2484 = vmatprep.subr.bf16.mxu0 %v2655_v56 }
  0x1b   : > { %v330_v51 = vpack.c.bf16 %v314_v50, %v313_v49 }
  0x1c   : > { %2413 = vmatmul.mubr.msk.bf16.gmra.mrb[4].mxu0 %vm339_vm1, %v318_v17 }
  0x1d   : > { %2416 = vmatprep.mubr.msk.bf16.mxu0 %vm339_vm1, %v319_v18  ;;  %2485 = vmatpush3.bf16.msra.mxu0 %v2655_v56 }
  0x1e   : > { %2486 = vmatprep.subr.bf16.mxu0 %v2656_v57 }
  0x21   : > { %2487 = vmatpush3.bf16.msra.mxu0 %v2656_v57 }
  0x24   : > { %2417 = vmatmul.mubr.msk.bf16.gmra.mrb[8].mxu0 %vm339_vm1, %v320_v23 }
  0x25   : > { %2420 = vmatprep.mubr.msk.bf16.mxu0 %vm339_vm1, %v321_v24 }
  0x2c   : > { %2421 = vmatmul.mubr.msk.bf16.gmra.mrb[12].mxu0 %vm339_vm1, %v322_v29 }
  0x2d   : > { %2424 = vmatprep.mubr.msk.bf16.mxu0 %vm339_vm1, %v323_v30 }
  0x34   : > { %2425 = vmatmul.mubr.msk.bf16.gmra.mrb[16].mxu0 %vm339_vm1, %v324_v35 }
  0x35   : > { %2428 = vmatprep.mubr.msk.bf16.mxu0 %vm339_vm1, %v325_v36 }
  0x3c   : > { %2429 = vmatmul.mubr.msk.bf16.gmra.mrb[20].mxu0 %vm339_vm1, %v326_v41 }
  0x3d   : > { %2432 = vmatprep.mubr.msk.bf16.mxu0 %vm339_vm1, %v327_v42 }
  0x44   : > { %2433 = vmatmul.mubr.msk.bf16.gmra.mrb[24].mxu0 %vm339_vm1, %v328_v47 }
  0x45   : > { %2436 = vmatprep.mubr.msk.bf16.mxu0 %vm339_vm1, %v329_v48 }
  0x4c   : > { %2437 = vmatmul.mubr.msk.bf16.gmra.mrb[28].mxu0 %vm339_vm1, %v330_v51 }
  0xe7   : > { %v2410_v59 = vpop.f32.mrb[0].mxu0 }
  0xe8   : > { %v435_v60 = vadd.f32 %v2410_v59, %v2813_v58  ;;  %v426_v61 = vpop.f32.mrb[1].mxu0 }
  0xe9   : > { %v427_v62 = vadd.f32 %v2813_v58, %v426_v61  ;;  %v2411_v63 = vpop.f32.mrb[2].mxu0 }
  0xea   : > { %v438_v0 = vadd.f32 %v2411_v63, %v2813_v58  ;;  %v429_v1 = vpop.f32.mrb[3].mxu0  ;;  %v555_v3 = vmax.f32 %v435_v60, 0.0 }
  0xeb   : > { %v430_v2 = vadd.f32 %v2813_v58, %v429_v1  ;;  %v553_v5 = vmax.f32 %v427_v62, 0.0 }
  0xec   : > { %v556_v4 = vmax.f32 %v438_v0, 0.0 }
  0xed   : > { %v554_v6 = vmax.f32 %v430_v2, 0.0 }
  0xee   : > { %v586_v7 = vpack.c.bf16 %v556_v4, %v555_v3 }
  0xef   : > { %v2414_v8 = vpop.f32.mrb[4].mxu0  ;;  %v585_v9 = vpack.c.bf16 %v554_v6, %v553_v5 }
  0xf0   : > { %v451_v10 = vadd.f32 %v2414_v8, %v2813_v58  ;;  %v442_v11 = vpop.f32.mrb[5].mxu0 }
  0xf1   : > { %v443_v12 = vadd.f32 %v2813_v58, %v442_v11  ;;  %v2415_v13 = vpop.f32.mrb[6].mxu0  ;;  %2448 = vmatprep.mubr.msk.bf16.mxu1 %vm640_vm2, %v585_v9 }
  0xf2   : > { %v454_v14 = vadd.f32 %v2415_v13, %v2813_v58  ;;  %v445_v15 = vpop.f32.mrb[7].mxu0  ;;  %2449 = vmatmul.mubr.msk.bf16.vlgmr.msra.gmra.mrb[0].mxu1 %vm640_vm2, %v586_v7  ;;  %v559_v17 = vmax.f32 %v451_v10, 0.0 }
  0xf3   : > { %v446_v16 = vadd.f32 %v2813_v58, %v445_v15  ;;  %v557_v19 = vmax.f32 %v443_v12, 0.0 }
  0xf4   : > { %v560_v18 = vmax.f32 %v454_v14, 0.0 }
  0xf5   : > { %v558_v20 = vmax.f32 %v446_v16, 0.0 }
  0xf6   : > { %v588_v21 = vpack.c.bf16 %v560_v18, %v559_v17 }
  0xf7   : > { %v587_v22 = vpack.c.bf16 %v558_v20, %v557_v19  ;;  %v2418_v23 = vpop.f32.mrb[8].mxu0 }
  0xf8   : > { %v467_v24 = vadd.f32 %v2418_v23, %v2813_v58  ;;  %v458_v25 = vpop.f32.mrb[9].mxu0 }
  0xf9   : > { %v459_v26 = vadd.f32 %v2813_v58, %v458_v25  ;;  %v2419_v27 = vpop.f32.mrb[10].mxu0  ;;  %2452 = vmatprep.mubr.msk.bf16.mxu1 %vm640_vm2, %v587_v22 }
  0xfa   : > { %v470_v28 = vadd.f32 %v2419_v27, %v2813_v58  ;;  %v461_v29 = vpop.f32.mrb[11].mxu0  ;;  %2453 = vmatmul.mubr.msk.bf16.gmra.mrb[4].mxu1 %vm640_vm2, %v588_v21  ;;  %v563_v31 = vmax.f32 %v467_v24, 0.0 }
  0xfb   : > { %v462_v30 = vadd.f32 %v2813_v58, %v461_v29  ;;  %v561_v33 = vmax.f32 %v459_v26, 0.0 }
  0xfc   : > { %v564_v32 = vmax.f32 %v470_v28, 0.0 }
  0xfd   : > { %v562_v34 = vmax.f32 %v462_v30, 0.0 }
  0xfe   : > { %v590_v35 = vpack.c.bf16 %v564_v32, %v563_v31 }
  0xff   : > { %v589_v36 = vpack.c.bf16 %v562_v34, %v561_v33  ;;  %v2422_v37 = vpop.f32.mrb[12].mxu0 }
 0x100   : > { %v483_v38 = vadd.f32 %v2422_v37, %v2813_v58  ;;  %v474_v39 = vpop.f32.mrb[13].mxu0 }
 0x101   : > { %v475_v40 = vadd.f32 %v2813_v58, %v474_v39  ;;  %v2423_v41 = vpop.f32.mrb[14].mxu0  ;;  %2456 = vmatprep.mubr.msk.bf16.mxu1 %vm640_vm2, %v589_v36 }
 0x102   : > { %v486_v42 = vadd.f32 %v2423_v41, %v2813_v58  ;;  %v477_v43 = vpop.f32.mrb[15].mxu0  ;;  %2457 = vmatmul.mubr.msk.bf16.gmra.mrb[8].mxu1 %vm640_vm2, %v590_v35  ;;  %v567_v45 = vmax.f32 %v483_v38, 0.0 }
 0x103   : > { %v478_v44 = vadd.f32 %v2813_v58, %v477_v43  ;;  %v565_v47 = vmax.f32 %v475_v40, 0.0 }
 0x104   : > { %v568_v46 = vmax.f32 %v486_v42, 0.0 }
 0x105   : > { %v566_v48 = vmax.f32 %v478_v44, 0.0  ;;  %v2657_v44 = vld [vmem:[%s3225_s3 + $0x40] sm:$0xff]  }
 0x106   : > { %v592_v49 = vpack.c.bf16 %v568_v46, %v567_v45  ;;  %v2658_v45 = vld [vmem:[%s3225_s3 + $0x48] sm:$0xff]   ;;  %2520 = vmatprep.subr.bf16.mxu1 %v2657_v44  ;;  %v2660_v46 = vld [vmem:[%s3225_s3 + $0x58] sm:$0xff]  }
 0x107   : > { %v591_v50 = vpack.c.bf16 %v566_v48, %v565_v47  ;;  %v2426_v51 = vpop.f32.mrb[16].mxu0  ;;  %2521 = vmatpush3.bf16.msra.mxu1 %v2657_v44  ;;  %v2878_v47 = vld [vmem:[%s3226_s4] ss:$0 sm:$0xff] }
 0x108   : > { %v499_v52 = vadd.f32 %v2426_v51, %v2813_v58  ;;  %v490_v53 = vpop.f32.mrb[17].mxu0  ;;  %2522 = vmatprep.subr.bf16.mxu1 %v2658_v45 }
 0x109   : > { %v491_v54 = vadd.f32 %v2813_v58, %v490_v53  ;;  %v2427_v55 = vpop.f32.mrb[18].mxu0  ;;  %2460 = vmatprep.mubr.msk.bf16.mxu1 %vm640_vm2, %v591_v50 }
 0x10a   : > { %v502_v56 = vadd.f32 %v2427_v55, %v2813_v58  ;;  %v493_v57 = vpop.f32.mrb[19].mxu0  ;;  %2461 = vmatmul.mubr.msk.bf16.gmra.mrb[12].mxu1 %vm640_vm2, %v592_v49  ;;  %v571_v60 = vmax.f32 %v499_v52, 0.0 }
 0x10b   : > { %v494_v59 = vadd.f32 %v2813_v58, %v493_v57  ;;  %v569_v62 = vmax.f32 %v491_v54, 0.0  ;;  %2523 = vmatpush3.bf16.msra.mxu1 %v2658_v45 }
 0x10c   : > { %v572_v61 = vmax.f32 %v502_v56, 0.0 }
 0x10d   : > { %v570_v63 = vmax.f32 %v494_v59, 0.0 }
 0x10e   : > { %v594_v0 = vpack.c.bf16 %v572_v61, %v571_v60 }
 0x10f   : > { %v593_v1 = vpack.c.bf16 %v570_v63, %v569_v62  ;;  %v2430_v2 = vpop.f32.mrb[20].mxu0 }
 0x110   : > { %v515_v3 = vadd.f32 %v2430_v2, %v2813_v58  ;;  %v506_v4 = vpop.f32.mrb[21].mxu0 }
 0x111   : > { %v507_v5 = vadd.f32 %v2813_v58, %v506_v4  ;;  %v2431_v6 = vpop.f32.mrb[22].mxu0  ;;  %2464 = vmatprep.mubr.msk.bf16.mxu1 %vm640_vm2, %v593_v1 }
 0x112   : > { %v518_v7 = vadd.f32 %v2431_v6, %v2813_v58  ;;  %v509_v8 = vpop.f32.mrb[23].mxu0  ;;  %2465 = vmatmul.mubr.msk.bf16.gmra.mrb[16].mxu1 %vm640_vm2, %v594_v0  ;;  %v575_v10 = vmax.f32 %v515_v3, 0.0 }
 0x113   : > { %v510_v9 = vadd.f32 %v2813_v58, %v509_v8  ;;  %v573_v12 = vmax.f32 %v507_v5, 0.0 }
 0x114   : > { %v576_v11 = vmax.f32 %v518_v7, 0.0 }
 0x115   : > { %v574_v13 = vmax.f32 %v510_v9, 0.0 }
 0x116   : > { %v596_v14 = vpack.c.bf16 %v576_v11, %v575_v10 }
 0x117   : > { %v595_v15 = vpack.c.bf16 %v574_v13, %v573_v12  ;;  %v2434_v16 = vpop.f32.mrb[24].mxu0 }
 0x118   : > { %v531_v17 = vadd.f32 %v2434_v16, %v2813_v58  ;;  %v522_v18 = vpop.f32.mrb[25].mxu0 }
 0x119   : > { %v523_v19 = vadd.f32 %v2813_v58, %v522_v18  ;;  %v2435_v20 = vpop.f32.mrb[26].mxu0  ;;  %2468 = vmatprep.mubr.msk.bf16.mxu1 %vm640_vm2, %v595_v15 }
 0x11a   : > { %v534_v21 = vadd.f32 %v2435_v20, %v2813_v58  ;;  %v525_v22 = vpop.f32.mrb[27].mxu0  ;;  %2469 = vmatmul.mubr.msk.bf16.gmra.mrb[20].mxu1 %vm640_vm2, %v596_v14  ;;  %v579_v24 = vmax.f32 %v531_v17, 0.0 }
 0x11b   : > { %v526_v23 = vadd.f32 %v2813_v58, %v525_v22  ;;  %v577_v26 = vmax.f32 %v523_v19, 0.0 }
 0x11c   : > { %v580_v25 = vmax.f32 %v534_v21, 0.0 }
 0x11d   : > { %v578_v27 = vmax.f32 %v526_v23, 0.0 }
 0x11e   : > { %v598_v28 = vpack.c.bf16 %v580_v25, %v579_v24 }
 0x11f   : > { %v597_v29 = vpack.c.bf16 %v578_v27, %v577_v26  ;;  %v2438_v30 = vpop.f32.mrb[28].mxu0 }
 0x120   : > { %v547_v31 = vadd.f32 %v2438_v30, %v2813_v58  ;;  %v538_v32 = vpop.f32.mrb[29].mxu0 }
 0x121   : > { %v539_v33 = vadd.f32 %v2813_v58, %v538_v32  ;;  %v2439_v34 = vpop.f32.mrb[30].mxu0  ;;  %2472 = vmatprep.mubr.msk.bf16.mxu1 %vm640_vm2, %v597_v29 }
 0x122   : > { %v550_v35 = vadd.f32 %v2439_v34, %v2813_v58  ;;  %v541_v36 = vpop.f32.mrb[31].mxu0  ;;  %2473 = vmatmul.mubr.msk.bf16.gmra.mrb[24].mxu1 %vm640_vm2, %v598_v28  ;;  %v583_v38 = vmax.f32 %v547_v31, 0.0 }
 0x123   : > { %v542_v37 = vadd.f32 %v2813_v58, %v541_v36  ;;  %v581_v40 = vmax.f32 %v539_v33, 0.0  ;;  %v2659_v58 = vld [vmem:[%s3225_s3 + $0x50] sm:$0xff]  }
 0x124   : > { %v584_v39 = vmax.f32 %v550_v35, 0.0  ;;  %2524 = vmatprep.subr.bf16.mxu1 %v2659_v58 }
 0x125   : > { %v582_v41 = vmax.f32 %v542_v37, 0.0  ;;  %2525 = vmatpush3.bf16.msra.mxu1 %v2659_v58 }
 0x126   : > { %v600_v42 = vpack.c.bf16 %v584_v39, %v583_v38  ;;  %2526 = vmatprep.subr.bf16.mxu1 %v2660_v46 }
 0x127   : > { %v599_v43 = vpack.c.bf16 %v582_v41, %v581_v40 }
 0x129   : > { %2476 = vmatprep.mubr.msk.bf16.mxu1 %vm640_vm2, %v599_v43  ;;  %2527 = vmatpush3.bf16.msra.mxu1 %v2660_v46 }
 0x12a   : > { %2477 = vmatmul.mubr.msk.bf16.gmra.mrb[28].mxu1 %vm640_vm2, %v600_v42 }
 0x1c5   : > { %v2450_v48 = vpop.f32.mrb[0].mxu1 }
 0x1c6   : > { %v732_v49 = vadd.f32 %v2450_v48, %v2878_v47  ;;  %v723_v50 = vpop.f32.mrb[1].mxu1 }
 0x1c7   : > { %v724_v51 = vadd.f32 %v2878_v47, %v723_v50  ;;  %v2451_v52 = vpop.f32.mrb[2].mxu1 }
 0x1c8   : > { %v735_v53 = vadd.f32 %v2451_v52, %v2878_v47  ;;  %v726_v54 = vpop.f32.mrb[3].mxu1  ;;  %v852_v56 = vmax.f32 %v732_v49, 0.0 }
 0x1c9   : > { %v727_v55 = vadd.f32 %v2878_v47, %v726_v54  ;;  %v850_v59 = vmax.f32 %v724_v51, 0.0 }
 0x1ca   : > { %v853_v57 = vmax.f32 %v735_v53, 0.0 }
 0x1cb   : > { %v851_v60 = vmax.f32 %v727_v55, 0.0 }
 0x1cc   : > { %v883_v61 = vpack.c.bf16 %v853_v57, %v852_v56 }
 0x1cd   : > { %v882_v62 = vpack.c.bf16 %v851_v60, %v850_v59  ;;  %v2454_v63 = vpop.f32.mrb[4].mxu1 }
 0x1ce   : > { %v748_v0 = vadd.f32 %v2454_v63, %v2878_v47  ;;  %v739_v1 = vpop.f32.mrb[5].mxu1 }
 0x1cf   : > { %v740_v2 = vadd.f32 %v2878_v47, %v739_v1  ;;  %v2455_v3 = vpop.f32.mrb[6].mxu1  ;;  %2488 = vmatprep.mubr.msk.bf16.mxu0 %vm640_vm2, %v882_v62 }
 0x1d0   : > { %v751_v4 = vadd.f32 %v2455_v3, %v2878_v47  ;;  %v742_v5 = vpop.f32.mrb[7].mxu1  ;;  %2489 = vmatmul.mubr.msk.bf16.vlgmr.msra.gmra.mrb[32].mxu0 %vm640_vm2, %v883_v61  ;;  %v856_v7 = vmax.f32 %v748_v0, 0.0 }
 0x1d1   : > { %v743_v6 = vadd.f32 %v2878_v47, %v742_v5  ;;  %v854_v9 = vmax.f32 %v740_v2, 0.0 }
 0x1d2   : > { %v857_v8 = vmax.f32 %v751_v4, 0.0 }
 0x1d3   : > { %v855_v10 = vmax.f32 %v743_v6, 0.0 }
 0x1d4   : > { %v885_v11 = vpack.c.bf16 %v857_v8, %v856_v7 }
 0x1d5   : > { %v884_v12 = vpack.c.bf16 %v855_v10, %v854_v9  ;;  %v2458_v13 = vpop.f32.mrb[8].mxu1 }
 0x1d6   : > { %v764_v14 = vadd.f32 %v2458_v13, %v2878_v47  ;;  %v755_v15 = vpop.f32.mrb[9].mxu1 }
 0x1d7   : > { %v756_v16 = vadd.f32 %v2878_v47, %v755_v15  ;;  %v2459_v17 = vpop.f32.mrb[10].mxu1  ;;  %2492 = vmatprep.mubr.msk.bf16.mxu0 %vm640_vm2, %v884_v12 }
 0x1d8   : > { %v767_v18 = vadd.f32 %v2459_v17, %v2878_v47  ;;  %v758_v19 = vpop.f32.mrb[11].mxu1  ;;  %2493 = vmatmul.mubr.msk.bf16.gmra.mrb[36].mxu0 %vm640_vm2, %v885_v11  ;;  %v860_v21 = vmax.f32 %v764_v14, 0.0 }
 0x1d9   : > { %v759_v20 = vadd.f32 %v2878_v47, %v758_v19  ;;  %v858_v23 = vmax.f32 %v756_v16, 0.0 }
 0x1da   : > { %v861_v22 = vmax.f32 %v767_v18, 0.0 }
 0x1db   : > { %v859_v24 = vmax.f32 %v759_v20, 0.0 }
 0x1dc   : > { %v887_v25 = vpack.c.bf16 %v861_v22, %v860_v21 }
 0x1dd   : > { %v886_v26 = vpack.c.bf16 %v859_v24, %v858_v23  ;;  %v2462_v27 = vpop.f32.mrb[12].mxu1 }
 0x1de   : > { %v780_v28 = vadd.f32 %v2462_v27, %v2878_v47  ;;  %v771_v29 = vpop.f32.mrb[13].mxu1 }
 0x1df   : > { %v772_v30 = vadd.f32 %v2878_v47, %v771_v29  ;;  %v2463_v31 = vpop.f32.mrb[14].mxu1  ;;  %2496 = vmatprep.mubr.msk.bf16.mxu0 %vm640_vm2, %v886_v26 }
 0x1e0   : > { %v783_v32 = vadd.f32 %v2463_v31, %v2878_v47  ;;  %v774_v33 = vpop.f32.mrb[15].mxu1  ;;  %2497 = vmatmul.mubr.msk.bf16.gmra.mrb[40].mxu0 %vm640_vm2, %v887_v25  ;;  %v864_v35 = vmax.f32 %v780_v28, 0.0 }
 0x1e1   : > { %v775_v34 = vadd.f32 %v2878_v47, %v774_v33  ;;  %v862_v37 = vmax.f32 %v772_v30, 0.0 }
 0x1e2   : > { %v865_v36 = vmax.f32 %v783_v32, 0.0 }
 0x1e3   : > { %v863_v38 = vmax.f32 %v775_v34, 0.0  ;;  %v2661_v34 = vld [vmem:[%s3225_s3 + $0x60] sm:$0xff]  }
 0x1e4   : > { %v889_v39 = vpack.c.bf16 %v865_v36, %v864_v35  ;;  %v2662_v35 = vld [vmem:[%s3225_s3 + $0x68] sm:$0xff]   ;;  %2560 = vmatprep.subr.bf16.mxu0 %v2661_v34  ;;  %v2664_v36 = vld [vmem:[%s3225_s3 + $0x78] sm:$0xff]  }
 0x1e5   : > { %v888_v40 = vpack.c.bf16 %v863_v38, %v862_v37  ;;  %v2466_v41 = vpop.f32.mrb[16].mxu1  ;;  %2561 = vmatpush3.bf16.msra.mxu0 %v2661_v34  ;;  %v2943_v37 = vld [vmem:[%s3226_s4 + $0x1] ss:$0 sm:$0xff] }
 0x1e6   : > { %v796_v42 = vadd.f32 %v2466_v41, %v2878_v47  ;;  %v787_v43 = vpop.f32.mrb[17].mxu1  ;;  %2562 = vmatprep.subr.bf16.mxu0 %v2662_v35 }
 0x1e7   : > { %v788_v44 = vadd.f32 %v2878_v47, %v787_v43  ;;  %v2467_v45 = vpop.f32.mrb[18].mxu1  ;;  %2500 = vmatprep.mubr.msk.bf16.mxu0 %vm640_vm2, %v888_v40 }
 0x1e8   : > { %v799_v58 = vadd.f32 %v2467_v45, %v2878_v47  ;;  %v790_v46 = vpop.f32.mrb[19].mxu1  ;;  %2501 = vmatmul.mubr.msk.bf16.gmra.mrb[44].mxu0 %vm640_vm2, %v889_v39  ;;  %v868_v49 = vmax.f32 %v796_v42, 0.0 }
 0x1e9   : > { %v791_v48 = vadd.f32 %v2878_v47, %v790_v46  ;;  %v866_v51 = vmax.f32 %v788_v44, 0.0  ;;  %2563 = vmatpush3.bf16.msra.mxu0 %v2662_v35 }
 0x1ea   : > { %v869_v50 = vmax.f32 %v799_v58, 0.0 }
 0x1eb   : > { %v867_v52 = vmax.f32 %v791_v48, 0.0 }
 0x1ec   : > { %v891_v53 = vpack.c.bf16 %v869_v50, %v868_v49 }
 0x1ed   : > { %v890_v54 = vpack.c.bf16 %v867_v52, %v866_v51  ;;  %v2470_v55 = vpop.f32.mrb[20].mxu1 }
 0x1ee   : > { %v812_v56 = vadd.f32 %v2470_v55, %v2878_v47  ;;  %v803_v57 = vpop.f32.mrb[21].mxu1 }
 0x1ef   : > { %v804_v59 = vadd.f32 %v2878_v47, %v803_v57  ;;  %v2471_v60 = vpop.f32.mrb[22].mxu1  ;;  %2504 = vmatprep.mubr.msk.bf16.mxu0 %vm640_vm2, %v890_v54 }
 0x1f0   : > { %v815_v61 = vadd.f32 %v2471_v60, %v2878_v47  ;;  %v806_v62 = vpop.f32.mrb[23].mxu1  ;;  %2505 = vmatmul.mubr.msk.bf16.gmra.mrb[48].mxu0 %vm640_vm2, %v891_v53  ;;  %v872_v0 = vmax.f32 %v812_v56, 0.0 }
 0x1f1   : > { %v807_v63 = vadd.f32 %v2878_v47, %v806_v62  ;;  %v870_v2 = vmax.f32 %v804_v59, 0.0 }
 0x1f2   : > { %v873_v1 = vmax.f32 %v815_v61, 0.0 }
 0x1f3   : > { %v871_v3 = vmax.f32 %v807_v63, 0.0 }
 0x1f4   : > { %v893_v4 = vpack.c.bf16 %v873_v1, %v872_v0 }
 0x1f5   : > { %v892_v5 = vpack.c.bf16 %v871_v3, %v870_v2  ;;  %v2474_v6 = vpop.f32.mrb[24].mxu1 }
 0x1f6   : > { %v828_v7 = vadd.f32 %v2474_v6, %v2878_v47  ;;  %v819_v8 = vpop.f32.mrb[25].mxu1 }
 0x1f7   : > { %v820_v9 = vadd.f32 %v2878_v47, %v819_v8  ;;  %v2475_v10 = vpop.f32.mrb[26].mxu1  ;;  %2508 = vmatprep.mubr.msk.bf16.mxu0 %vm640_vm2, %v892_v5 }
 0x1f8   : > { %v831_v11 = vadd.f32 %v2475_v10, %v2878_v47  ;;  %v822_v12 = vpop.f32.mrb[27].mxu1  ;;  %2509 = vmatmul.mubr.msk.bf16.gmra.mrb[52].mxu0 %vm640_vm2, %v893_v4  ;;  %v876_v14 = vmax.f32 %v828_v7, 0.0 }
 0x1f9   : > { %v823_v13 = vadd.f32 %v2878_v47, %v822_v12  ;;  %v874_v16 = vmax.f32 %v820_v9, 0.0 }
 0x1fa   : > { %v877_v15 = vmax.f32 %v831_v11, 0.0 }
 0x1fb   : > { %v875_v17 = vmax.f32 %v823_v13, 0.0 }
 0x1fc   : > { %v895_v18 = vpack.c.bf16 %v877_v15, %v876_v14 }
 0x1fd   : > { %v894_v19 = vpack.c.bf16 %v875_v17, %v874_v16  ;;  %v2478_v20 = vpop.f32.mrb[28].mxu1 }
 0x1fe   : > { %v844_v21 = vadd.f32 %v2478_v20, %v2878_v47  ;;  %v835_v22 = vpop.f32.mrb[29].mxu1 }
 0x1ff   : > { %v836_v23 = vadd.f32 %v2878_v47, %v835_v22  ;;  %v2479_v24 = vpop.f32.mrb[30].mxu1  ;;  %2512 = vmatprep.mubr.msk.bf16.mxu0 %vm640_vm2, %v894_v19 }
 0x200   : > { %v847_v25 = vadd.f32 %v2479_v24, %v2878_v47  ;;  %v838_v26 = vpop.f32.mrb[31].mxu1  ;;  %2513 = vmatmul.mubr.msk.bf16.gmra.mrb[56].mxu0 %vm640_vm2, %v895_v18  ;;  %v880_v28 = vmax.f32 %v844_v21, 0.0 }
 0x201   : > { %v839_v27 = vadd.f32 %v2878_v47, %v838_v26  ;;  %v878_v30 = vmax.f32 %v836_v23, 0.0  ;;  %v2663_v47 = vld [vmem:[%s3225_s3 + $0x70] sm:$0xff]  }
 0x202   : > { %v881_v29 = vmax.f32 %v847_v25, 0.0  ;;  %2564 = vmatprep.subr.bf16.mxu0 %v2663_v47 }
 0x203   : > { %v879_v31 = vmax.f32 %v839_v27, 0.0  ;;  %2565 = vmatpush3.bf16.msra.mxu0 %v2663_v47 }
 0x204   : > { %v897_v32 = vpack.c.bf16 %v881_v29, %v880_v28  ;;  %2566 = vmatprep.subr.bf16.mxu0 %v2664_v36 }
 0x205   : > { %v896_v33 = vpack.c.bf16 %v879_v31, %v878_v30 }
 0x207   : > { %2516 = vmatprep.mubr.msk.bf16.mxu0 %vm640_vm2, %v896_v33  ;;  %2567 = vmatpush3.bf16.msra.mxu0 %v2664_v36 }
 0x208   : > { %2517 = vmatmul.mubr.msk.bf16.gmra.mrb[60].mxu0 %vm640_vm2, %v897_v32 }
 0x2a3   : > { %v2490_v38 = vpop.f32.mrb[32].mxu0 }
 0x2a4   : > { %v1030_v39 = vadd.f32 %v2490_v38, %v2943_v37  ;;  %v1021_v40 = vpop.f32.mrb[33].mxu0 }
 0x2a5   : > { %v1022_v41 = vadd.f32 %v2943_v37, %v1021_v40  ;;  %v2491_v42 = vpop.f32.mrb[34].mxu0 }
 0x2a6   : > { %v1033_v43 = vadd.f32 %v2491_v42, %v2943_v37  ;;  %v1024_v44 = vpop.f32.mrb[35].mxu0  ;;  %v1150_v58 = vmax.f32 %v1030_v39, 0.0 }
 0x2a7   : > { %v1025_v45 = vadd.f32 %v2943_v37, %v1024_v44  ;;  %v1148_v48 = vmax.f32 %v1022_v41, 0.0 }
 0x2a8   : > { %v1151_v46 = vmax.f32 %v1033_v43, 0.0 }
 0x2a9   : > { %v1149_v49 = vmax.f32 %v1025_v45, 0.0 }
 0x2aa   : > { %v1181_v50 = vpack.c.bf16 %v1151_v46, %v1150_v58 }
 0x2ab   : > { %v1180_v51 = vpack.c.bf16 %v1149_v49, %v1148_v48  ;;  %v2494_v52 = vpop.f32.mrb[36].mxu0 }
 0x2ac   : > { %v1046_v53 = vadd.f32 %v2494_v52, %v2943_v37  ;;  %v1037_v54 = vpop.f32.mrb[37].mxu0 }
 0x2ad   : > { %v1038_v55 = vadd.f32 %v2943_v37, %v1037_v54  ;;  %v2495_v56 = vpop.f32.mrb[38].mxu0  ;;  %2528 = vmatprep.mubr.msk.bf16.mxu1 %vm640_vm2, %v1180_v51 }
 0x2ae   : > { %v1049_v57 = vadd.f32 %v2495_v56, %v2943_v37  ;;  %v1040_v59 = vpop.f32.mrb[39].mxu0  ;;  %2529 = vmatmul.mubr.msk.bf16.vlgmr.msra.gmra.mrb[32].mxu1 %vm640_vm2, %v1181_v50  ;;  %v1154_v61 = vmax.f32 %v1046_v53, 0.0 }
 0x2af   : > { %v1041_v60 = vadd.f32 %v2943_v37, %v1040_v59  ;;  %v1152_v63 = vmax.f32 %v1038_v55, 0.0 }
 0x2b0   : > { %v1155_v62 = vmax.f32 %v1049_v57, 0.0 }
 0x2b1   : > { %v1153_v0 = vmax.f32 %v1041_v60, 0.0 }
 0x2b2   : > { %v1183_v1 = vpack.c.bf16 %v1155_v62, %v1154_v61 }
 0x2b3   : > { %v1182_v2 = vpack.c.bf16 %v1153_v0, %v1152_v63  ;;  %v2498_v3 = vpop.f32.mrb[40].mxu0 }
 0x2b4   : > { %v1062_v4 = vadd.f32 %v2498_v3, %v2943_v37  ;;  %v1053_v5 = vpop.f32.mrb[41].mxu0 }
 0x2b5   : > { %v1054_v6 = vadd.f32 %v2943_v37, %v1053_v5  ;;  %v2499_v7 = vpop.f32.mrb[42].mxu0  ;;  %2532 = vmatprep.mubr.msk.bf16.mxu1 %vm640_vm2, %v1182_v2 }
 0x2b6   : > { %v1065_v8 = vadd.f32 %v2499_v7, %v2943_v37  ;;  %v1056_v9 = vpop.f32.mrb[43].mxu0  ;;  %2533 = vmatmul.mubr.msk.bf16.gmra.mrb[36].mxu1 %vm640_vm2, %v1183_v1  ;;  %v1158_v11 = vmax.f32 %v1062_v4, 0.0 }
 0x2b7   : > { %v1057_v10 = vadd.f32 %v2943_v37, %v1056_v9  ;;  %v1156_v13 = vmax.f32 %v1054_v6, 0.0 }
 0x2b8   : > { %v1159_v12 = vmax.f32 %v1065_v8, 0.0 }
 0x2b9   : > { %v1157_v14 = vmax.f32 %v1057_v10, 0.0 }
 0x2ba   : > { %v1185_v15 = vpack.c.bf16 %v1159_v12, %v1158_v11 }
 0x2bb   : > { %v1184_v16 = vpack.c.bf16 %v1157_v14, %v1156_v13  ;;  %v2502_v17 = vpop.f32.mrb[44].mxu0 }
 0x2bc   : > { %v1078_v18 = vadd.f32 %v2502_v17, %v2943_v37  ;;  %v1069_v19 = vpop.f32.mrb[45].mxu0 }
 0x2bd   : > { %v1070_v20 = vadd.f32 %v2943_v37, %v1069_v19  ;;  %v2503_v21 = vpop.f32.mrb[46].mxu0  ;;  %2536 = vmatprep.mubr.msk.bf16.mxu1 %vm640_vm2, %v1184_v16 }
 0x2be   : > { %v1081_v22 = vadd.f32 %v2503_v21, %v2943_v37  ;;  %v1072_v23 = vpop.f32.mrb[47].mxu0  ;;  %2537 = vmatmul.mubr.msk.bf16.gmra.mrb[40].mxu1 %vm640_vm2, %v1185_v15  ;;  %v1162_v25 = vmax.f32 %v1078_v18, 0.0 }
 0x2bf   : > { %v1073_v24 = vadd.f32 %v2943_v37, %v1072_v23  ;;  %v1160_v27 = vmax.f32 %v1070_v20, 0.0 }
 0x2c0   : > { %v1163_v26 = vmax.f32 %v1081_v22, 0.0 }
 0x2c1   : > { %v1161_v28 = vmax.f32 %v1073_v24, 0.0  ;;  %v2665_v24 = vld [vmem:[%s3227_s5] sm:$0xff]  }
 0x2c2   : > { %v1187_v29 = vpack.c.bf16 %v1163_v26, %v1162_v25  ;;  %v2666_v25 = vld [vmem:[%s3227_s5 + $0x8] sm:$0xff]   ;;  %2600 = vmatprep.subr.bf16.mxu1 %v2665_v24  ;;  %v2668_v26 = vld [vmem:[%s3227_s5 + $0x18] sm:$0xff]  }
 0x2c3   : > { %v1186_v30 = vpack.c.bf16 %v1161_v28, %v1160_v27  ;;  %v2506_v31 = vpop.f32.mrb[48].mxu0  ;;  %2601 = vmatpush3.bf16.msra.mxu1 %v2665_v24  ;;  %v3008_v27 = vld [vmem:[%s3226_s4 + $0x2] ss:$0 sm:$0xff] }
 0x2c4   : > { %v1094_v32 = vadd.f32 %v2506_v31, %v2943_v37  ;;  %v1085_v33 = vpop.f32.mrb[49].mxu0  ;;  %2602 = vmatprep.subr.bf16.mxu1 %v2666_v25 }
 0x2c5   : > { %v1086_v34 = vadd.f32 %v2943_v37, %v1085_v33  ;;  %v2507_v35 = vpop.f32.mrb[50].mxu0  ;;  %2540 = vmatprep.mubr.msk.bf16.mxu1 %vm640_vm2, %v1186_v30 }
 0x2c6   : > { %v1097_v47 = vadd.f32 %v2507_v35, %v2943_v37  ;;  %v1088_v36 = vpop.f32.mrb[51].mxu0  ;;  %2541 = vmatmul.mubr.msk.bf16.gmra.mrb[44].mxu1 %vm640_vm2, %v1187_v29  ;;  %v1166_v39 = vmax.f32 %v1094_v32, 0.0 }
 0x2c7   : > { %v1089_v38 = vadd.f32 %v2943_v37, %v1088_v36  ;;  %v1164_v41 = vmax.f32 %v1086_v34, 0.0  ;;  %2603 = vmatpush3.bf16.msra.mxu1 %v2666_v25 }
 0x2c8   : > { %v1167_v40 = vmax.f32 %v1097_v47, 0.0 }
 0x2c9   : > { %v1165_v42 = vmax.f32 %v1089_v38, 0.0 }
 0x2ca   : > { %v1189_v43 = vpack.c.bf16 %v1167_v40, %v1166_v39 }
 0x2cb   : > { %v1188_v44 = vpack.c.bf16 %v1165_v42, %v1164_v41  ;;  %v2510_v45 = vpop.f32.mrb[52].mxu0 }
 0x2cc   : > { %v1110_v58 = vadd.f32 %v2510_v45, %v2943_v37  ;;  %v1101_v46 = vpop.f32.mrb[53].mxu0 }
 0x2cd   : > { %v1102_v48 = vadd.f32 %v2943_v37, %v1101_v46  ;;  %v2511_v49 = vpop.f32.mrb[54].mxu0  ;;  %2544 = vmatprep.mubr.msk.bf16.mxu1 %vm640_vm2, %v1188_v44 }
 0x2ce   : > { %v1113_v50 = vadd.f32 %v2511_v49, %v2943_v37  ;;  %v1104_v51 = vpop.f32.mrb[55].mxu0  ;;  %2545 = vmatmul.mubr.msk.bf16.gmra.mrb[48].mxu1 %vm640_vm2, %v1189_v43  ;;  %v1170_v53 = vmax.f32 %v1110_v58, 0.0 }
 0x2cf   : > { %v1105_v52 = vadd.f32 %v2943_v37, %v1104_v51  ;;  %v1168_v55 = vmax.f32 %v1102_v48, 0.0 }
 0x2d0   : > { %v1171_v54 = vmax.f32 %v1113_v50, 0.0 }
 0x2d1   : > { %v1169_v56 = vmax.f32 %v1105_v52, 0.0 }
 0x2d2   : > { %v1191_v57 = vpack.c.bf16 %v1171_v54, %v1170_v53 }
 0x2d3   : > { %v1190_v59 = vpack.c.bf16 %v1169_v56, %v1168_v55  ;;  %v2514_v60 = vpop.f32.mrb[56].mxu0 }
 0x2d4   : > { %v1126_v61 = vadd.f32 %v2514_v60, %v2943_v37  ;;  %v1117_v62 = vpop.f32.mrb[57].mxu0 }
 0x2d5   : > { %v1118_v63 = vadd.f32 %v2943_v37, %v1117_v62  ;;  %v2515_v0 = vpop.f32.mrb[58].mxu0  ;;  %2548 = vmatprep.mubr.msk.bf16.mxu1 %vm640_vm2, %v1190_v59 }
 0x2d6   : > { %v1129_v1 = vadd.f32 %v2515_v0, %v2943_v37  ;;  %v1120_v2 = vpop.f32.mrb[59].mxu0  ;;  %2549 = vmatmul.mubr.msk.bf16.gmra.mrb[52].mxu1 %vm640_vm2, %v1191_v57  ;;  %v1174_v4 = vmax.f32 %v1126_v61, 0.0 }
 0x2d7   : > { %v1121_v3 = vadd.f32 %v2943_v37, %v1120_v2  ;;  %v1172_v6 = vmax.f32 %v1118_v63, 0.0 }
 0x2d8   : > { %v1175_v5 = vmax.f32 %v1129_v1, 0.0 }
 0x2d9   : > { %v1173_v7 = vmax.f32 %v1121_v3, 0.0 }
 0x2da   : > { %v1193_v8 = vpack.c.bf16 %v1175_v5, %v1174_v4 }
 0x2db   : > { %v1192_v9 = vpack.c.bf16 %v1173_v7, %v1172_v6  ;;  %v2518_v10 = vpop.f32.mrb[60].mxu0 }
 0x2dc   : > { %v1142_v11 = vadd.f32 %v2518_v10, %v2943_v37  ;;  %v1133_v12 = vpop.f32.mrb[61].mxu0 }
 0x2dd   : > { %v1134_v13 = vadd.f32 %v2943_v37, %v1133_v12  ;;  %v2519_v14 = vpop.f32.mrb[62].mxu0  ;;  %2552 = vmatprep.mubr.msk.bf16.mxu1 %vm640_vm2, %v1192_v9 }
 0x2de   : > { %v1145_v15 = vadd.f32 %v2519_v14, %v2943_v37  ;;  %v1136_v16 = vpop.f32.mrb[63].mxu0  ;;  %2553 = vmatmul.mubr.msk.bf16.gmra.mrb[56].mxu1 %vm640_vm2, %v1193_v8  ;;  %v1178_v18 = vmax.f32 %v1142_v11, 0.0 }
 0x2df   : > { %v1137_v17 = vadd.f32 %v2943_v37, %v1136_v16  ;;  %v1176_v20 = vmax.f32 %v1134_v13, 0.0  ;;  %v2667_v37 = vld [vmem:[%s3227_s5 + $0x10] sm:$0xff]  }
 0x2e0   : > { %v1179_v19 = vmax.f32 %v1145_v15, 0.0  ;;  %2604 = vmatprep.subr.bf16.mxu1 %v2667_v37 }
 0x2e1   : > { %v1177_v21 = vmax.f32 %v1137_v17, 0.0  ;;  %2605 = vmatpush3.bf16.msra.mxu1 %v2667_v37 }
 0x2e2   : > { %v1195_v22 = vpack.c.bf16 %v1179_v19, %v1178_v18  ;;  %2606 = vmatprep.subr.bf16.mxu1 %v2668_v26 }
 0x2e3   : > { %v1194_v23 = vpack.c.bf16 %v1177_v21, %v1176_v20 }
 0x2e5   : > { %2556 = vmatprep.mubr.msk.bf16.mxu1 %vm640_vm2, %v1194_v23  ;;  %2607 = vmatpush3.bf16.msra.mxu1 %v2668_v26 }
 0x2e6   : > { %2557 = vmatmul.mubr.msk.bf16.gmra.mrb[60].mxu1 %vm640_vm2, %v1195_v22 }
 0x381   : > { %v2530_v28 = vpop.f32.mrb[32].mxu1 }
 0x382   : > { %v1328_v29 = vadd.f32 %v2530_v28, %v3008_v27  ;;  %v1319_v30 = vpop.f32.mrb[33].mxu1 }
 0x383   : > { %v1320_v31 = vadd.f32 %v3008_v27, %v1319_v30  ;;  %v2531_v32 = vpop.f32.mrb[34].mxu1 }
 0x384   : > { %v1331_v33 = vadd.f32 %v2531_v32, %v3008_v27  ;;  %v1322_v34 = vpop.f32.mrb[35].mxu1  ;;  %v1448_v47 = vmax.f32 %v1328_v29, 0.0 }
 0x385   : > { %v1323_v35 = vadd.f32 %v3008_v27, %v1322_v34  ;;  %v1446_v38 = vmax.f32 %v1320_v31, 0.0 }
 0x386   : > { %v1449_v36 = vmax.f32 %v1331_v33, 0.0 }
 0x387   : > { %v1447_v39 = vmax.f32 %v1323_v35, 0.0 }
 0x388   : > { %v1479_v40 = vpack.c.bf16 %v1449_v36, %v1448_v47 }
 0x389   : > { %v1478_v41 = vpack.c.bf16 %v1447_v39, %v1446_v38  ;;  %v2534_v42 = vpop.f32.mrb[36].mxu1 }
 0x38a   : > { %v1344_v43 = vadd.f32 %v2534_v42, %v3008_v27  ;;  %v1335_v44 = vpop.f32.mrb[37].mxu1 }
 0x38b   : > { %v1336_v45 = vadd.f32 %v3008_v27, %v1335_v44  ;;  %v2535_v58 = vpop.f32.mrb[38].mxu1  ;;  %2568 = vmatprep.mubr.msk.bf16.mxu0 %vm640_vm2, %v1478_v41 }
 0x38c   : > { %v1347_v46 = vadd.f32 %v2535_v58, %v3008_v27  ;;  %v1338_v48 = vpop.f32.mrb[39].mxu1  ;;  %2569 = vmatmul.mubr.msk.bf16.vlgmr.msra.gmra.mrb[64].mxu0 %vm640_vm2, %v1479_v40  ;;  %v1452_v50 = vmax.f32 %v1344_v43, 0.0 }
 0x38d   : > { %v1339_v49 = vadd.f32 %v3008_v27, %v1338_v48  ;;  %v1450_v52 = vmax.f32 %v1336_v45, 0.0 }
 0x38e   : > { %v1453_v51 = vmax.f32 %v1347_v46, 0.0 }
 0x38f   : > { %v1451_v53 = vmax.f32 %v1339_v49, 0.0 }
 0x390   : > { %v1481_v54 = vpack.c.bf16 %v1453_v51, %v1452_v50 }
 0x391   : > { %v1480_v55 = vpack.c.bf16 %v1451_v53, %v1450_v52  ;;  %v2538_v56 = vpop.f32.mrb[40].mxu1 }
 0x392   : > { %v1360_v57 = vadd.f32 %v2538_v56, %v3008_v27  ;;  %v1351_v59 = vpop.f32.mrb[41].mxu1 }
 0x393   : > { %v1352_v60 = vadd.f32 %v3008_v27, %v1351_v59  ;;  %v2539_v61 = vpop.f32.mrb[42].mxu1  ;;  %2572 = vmatprep.mubr.msk.bf16.mxu0 %vm640_vm2, %v1480_v55 }
 0x394   : > { %v1363_v62 = vadd.f32 %v2539_v61, %v3008_v27  ;;  %v1354_v63 = vpop.f32.mrb[43].mxu1  ;;  %2573 = vmatmul.mubr.msk.bf16.gmra.mrb[68].mxu0 %vm640_vm2, %v1481_v54  ;;  %v1456_v1 = vmax.f32 %v1360_v57, 0.0 }
 0x395   : > { %v1355_v0 = vadd.f32 %v3008_v27, %v1354_v63  ;;  %v1454_v3 = vmax.f32 %v1352_v60, 0.0 }
 0x396   : > { %v1457_v2 = vmax.f32 %v1363_v62, 0.0 }
 0x397   : > { %v1455_v4 = vmax.f32 %v1355_v0, 0.0 }
 0x398   : > { %v1483_v5 = vpack.c.bf16 %v1457_v2, %v1456_v1 }
 0x399   : > { %v1482_v6 = vpack.c.bf16 %v1455_v4, %v1454_v3  ;;  %v2542_v7 = vpop.f32.mrb[44].mxu1 }
 0x39a   : > { %v1376_v8 = vadd.f32 %v2542_v7, %v3008_v27  ;;  %v1367_v9 = vpop.f32.mrb[45].mxu1 }
 0x39b   : > { %v1368_v10 = vadd.f32 %v3008_v27, %v1367_v9  ;;  %v2543_v11 = vpop.f32.mrb[46].mxu1  ;;  %2576 = vmatprep.mubr.msk.bf16.mxu0 %vm640_vm2, %v1482_v6 }
 0x39c   : > { %v1379_v12 = vadd.f32 %v2543_v11, %v3008_v27  ;;  %v1370_v13 = vpop.f32.mrb[47].mxu1  ;;  %2577 = vmatmul.mubr.msk.bf16.gmra.mrb[72].mxu0 %vm640_vm2, %v1483_v5  ;;  %v1460_v15 = vmax.f32 %v1376_v8, 0.0 }
 0x39d   : > { %v1371_v14 = vadd.f32 %v3008_v27, %v1370_v13  ;;  %v1458_v17 = vmax.f32 %v1368_v10, 0.0 }
 0x39e   : > { %v1461_v16 = vmax.f32 %v1379_v12, 0.0 }
 0x39f   : > { %v1459_v18 = vmax.f32 %v1371_v14, 0.0  ;;  %v3061_v14 = vld [vmem:[%s3226_s4 + $0x3] ss:$0 sm:$0xff] }
 0x3a0   : > { %v1485_v19 = vpack.c.bf16 %v1461_v16, %v1460_v15 }
 0x3a1   : > { %v1484_v20 = vpack.c.bf16 %v1459_v18, %v1458_v17  ;;  %v2546_v21 = vpop.f32.mrb[48].mxu1 }
 0x3a2   : > { %v1392_v22 = vadd.f32 %v2546_v21, %v3008_v27  ;;  %v1383_v23 = vpop.f32.mrb[49].mxu1 }
 0x3a3   : > { %v1384_v24 = vadd.f32 %v3008_v27, %v1383_v23  ;;  %v2547_v25 = vpop.f32.mrb[50].mxu1  ;;  %2580 = vmatprep.mubr.msk.bf16.mxu0 %vm640_vm2, %v1484_v20 }
 0x3a4   : > { %v1395_v37 = vadd.f32 %v2547_v25, %v3008_v27  ;;  %v1386_v26 = vpop.f32.mrb[51].mxu1  ;;  %2581 = vmatmul.mubr.msk.bf16.gmra.mrb[76].mxu0 %vm640_vm2, %v1485_v19  ;;  %v1464_v29 = vmax.f32 %v1392_v22, 0.0 }
 0x3a5   : > { %v1387_v28 = vadd.f32 %v3008_v27, %v1386_v26  ;;  %v1462_v31 = vmax.f32 %v1384_v24, 0.0 }
 0x3a6   : > { %v1465_v30 = vmax.f32 %v1395_v37, 0.0 }
 0x3a7   : > { %v1463_v32 = vmax.f32 %v1387_v28, 0.0 }
 0x3a8   : > { %v1487_v33 = vpack.c.bf16 %v1465_v30, %v1464_v29 }
 0x3a9   : > { %v1486_v34 = vpack.c.bf16 %v1463_v32, %v1462_v31  ;;  %v2550_v35 = vpop.f32.mrb[52].mxu1 }
 0x3aa   : > { %v1408_v47 = vadd.f32 %v2550_v35, %v3008_v27  ;;  %v1399_v36 = vpop.f32.mrb[53].mxu1 }
 0x3ab   : > { %v1400_v38 = vadd.f32 %v3008_v27, %v1399_v36  ;;  %v2551_v39 = vpop.f32.mrb[54].mxu1  ;;  %2584 = vmatprep.mubr.msk.bf16.mxu0 %vm640_vm2, %v1486_v34 }
 0x3ac   : > { %v1411_v40 = vadd.f32 %v2551_v39, %v3008_v27  ;;  %v1402_v41 = vpop.f32.mrb[55].mxu1  ;;  %2585 = vmatmul.mubr.msk.bf16.gmra.mrb[80].mxu0 %vm640_vm2, %v1487_v33  ;;  %v1468_v43 = vmax.f32 %v1408_v47, 0.0 }
 0x3ad   : > { %v1403_v42 = vadd.f32 %v3008_v27, %v1402_v41  ;;  %v1466_v45 = vmax.f32 %v1400_v38, 0.0 }
 0x3ae   : > { %v1469_v44 = vmax.f32 %v1411_v40, 0.0 }
 0x3af   : > { %v1467_v58 = vmax.f32 %v1403_v42, 0.0 }
 0x3b0   : > { %v1489_v46 = vpack.c.bf16 %v1469_v44, %v1468_v43 }
 0x3b1   : > { %v1488_v48 = vpack.c.bf16 %v1467_v58, %v1466_v45  ;;  %v2554_v49 = vpop.f32.mrb[56].mxu1 }
 0x3b2   : > { %v1424_v50 = vadd.f32 %v2554_v49, %v3008_v27  ;;  %v1415_v51 = vpop.f32.mrb[57].mxu1 }
 0x3b3   : > { %v1416_v52 = vadd.f32 %v3008_v27, %v1415_v51  ;;  %v2555_v53 = vpop.f32.mrb[58].mxu1  ;;  %2588 = vmatprep.mubr.msk.bf16.mxu0 %vm640_vm2, %v1488_v48 }
 0x3b4   : > { %v1427_v54 = vadd.f32 %v2555_v53, %v3008_v27  ;;  %v1418_v55 = vpop.f32.mrb[59].mxu1  ;;  %2589 = vmatmul.mubr.msk.bf16.gmra.mrb[84].mxu0 %vm640_vm2, %v1489_v46  ;;  %v1472_v57 = vmax.f32 %v1424_v50, 0.0 }
 0x3b5   : > { %v1419_v56 = vadd.f32 %v3008_v27, %v1418_v55  ;;  %v1470_v60 = vmax.f32 %v1416_v52, 0.0 }
 0x3b6   : > { %v1473_v59 = vmax.f32 %v1427_v54, 0.0 }
 0x3b7   : > { %v1471_v61 = vmax.f32 %v1419_v56, 0.0 }
 0x3b8   : > { %v1491_v62 = vpack.c.bf16 %v1473_v59, %v1472_v57 }
 0x3b9   : > { %v1490_v63 = vpack.c.bf16 %v1471_v61, %v1470_v60  ;;  %v2558_v0 = vpop.f32.mrb[60].mxu1 }
 0x3ba   : > { %v1440_v1 = vadd.f32 %v2558_v0, %v3008_v27  ;;  %v1431_v2 = vpop.f32.mrb[61].mxu1 }
 0x3bb   : > { %v1432_v3 = vadd.f32 %v3008_v27, %v1431_v2  ;;  %v2559_v4 = vpop.f32.mrb[62].mxu1  ;;  %2592 = vmatprep.mubr.msk.bf16.mxu0 %vm640_vm2, %v1490_v63 }
 0x3bc   : > { %v1443_v5 = vadd.f32 %v2559_v4, %v3008_v27  ;;  %v1434_v6 = vpop.f32.mrb[63].mxu1  ;;  %2593 = vmatmul.mubr.msk.bf16.gmra.mrb[88].mxu0 %vm640_vm2, %v1491_v62  ;;  %v1476_v8 = vmax.f32 %v1440_v1, 0.0 }
 0x3bd   : > { %v1435_v7 = vadd.f32 %v3008_v27, %v1434_v6  ;;  %v1474_v10 = vmax.f32 %v1432_v3, 0.0 }
 0x3be   : > { %v1477_v9 = vmax.f32 %v1443_v5, 0.0 }
 0x3bf   : > { %v1475_v11 = vmax.f32 %v1435_v7, 0.0 }
 0x3c0   : > { %v1493_v12 = vpack.c.bf16 %v1477_v9, %v1476_v8 }
 0x3c1   : > { %v1492_v13 = vpack.c.bf16 %v1475_v11, %v1474_v10 }
 0x3c3   : > { %2596 = vmatprep.mubr.msk.bf16.mxu0 %vm640_vm2, %v1492_v13 }
 0x3c4   : > { %2597 = vmatmul.mubr.msk.bf16.gmra.mrb[92].mxu0 %vm640_vm2, %v1493_v12 }
 0x45f   : > { %v2570_v15 = vpop.f32.mrb[64].mxu0 }
 0x460   : > { %v1626_v16 = vadd.f32 %v2570_v15, %v3061_v14  ;;  %v1617_v17 = vpop.f32.mrb[65].mxu0 }
 0x461   : > { %v1618_v27 = vadd.f32 %v3061_v14, %v1617_v17  ;;  %v2571_v18 = vpop.f32.mrb[66].mxu0 }
 0x462   : > { %v1629_v19 = vadd.f32 %v2571_v18, %v3061_v14  ;;  %v1620_v20 = vpop.f32.mrb[67].mxu0  ;;  %v1746_v22 = vmax.f32 %v1626_v16, 0.0 }
 0x463   : > { %v1621_v21 = vadd.f32 %v3061_v14, %v1620_v20  ;;  %v1744_v24 = vmax.f32 %v1618_v27, 0.0 }
 0x464   : > { %v1747_v23 = vmax.f32 %v1629_v19, 0.0 }
 0x465   : > { %v1745_v25 = vmax.f32 %v1621_v21, 0.0 }
 0x466   : > { %v1777_v37 = vpack.c.bf16 %v1747_v23, %v1746_v22 }
 0x467   : > { %v1776_v26 = vpack.c.bf16 %v1745_v25, %v1744_v24  ;;  %v2574_v28 = vpop.f32.mrb[68].mxu0 }
 0x468   : > { %v1642_v29 = vadd.f32 %v2574_v28, %v3061_v14  ;;  %v1633_v30 = vpop.f32.mrb[69].mxu0 }
 0x469   : > { %v1634_v31 = vadd.f32 %v3061_v14, %v1633_v30  ;;  %v2575_v32 = vpop.f32.mrb[70].mxu0  ;;  %2608 = vmatprep.mubr.msk.bf16.mxu1 %vm640_vm2, %v1776_v26 }
 0x46a   : > { %v1645_v33 = vadd.f32 %v2575_v32, %v3061_v14  ;;  %v1636_v34 = vpop.f32.mrb[71].mxu0  ;;  %2609 = vmatmul.mubr.msk.bf16.vlgmr.msra.gmra.mrb[64].mxu1 %vm640_vm2, %v1777_v37  ;;  %v1750_v47 = vmax.f32 %v1642_v29, 0.0 }
 0x46b   : > { %v1637_v35 = vadd.f32 %v3061_v14, %v1636_v34  ;;  %v1748_v38 = vmax.f32 %v1634_v31, 0.0 }
 0x46c   : > { %v1751_v36 = vmax.f32 %v1645_v33, 0.0 }
 0x46d   : > { %v1749_v39 = vmax.f32 %v1637_v35, 0.0 }
 0x46e   : > { %v1779_v40 = vpack.c.bf16 %v1751_v36, %v1750_v47 }
 0x46f   : > { %v1778_v41 = vpack.c.bf16 %v1749_v39, %v1748_v38  ;;  %v2578_v42 = vpop.f32.mrb[72].mxu0 }
 0x470   : > { %v1658_v43 = vadd.f32 %v2578_v42, %v3061_v14  ;;  %v1649_v44 = vpop.f32.mrb[73].mxu0 }
 0x471   : > { %v1650_v45 = vadd.f32 %v3061_v14, %v1649_v44  ;;  %v2579_v58 = vpop.f32.mrb[74].mxu0  ;;  %2612 = vmatprep.mubr.msk.bf16.mxu1 %vm640_vm2, %v1778_v41 }
 0x472   : > { %v1661_v46 = vadd.f32 %v2579_v58, %v3061_v14  ;;  %v1652_v48 = vpop.f32.mrb[75].mxu0  ;;  %2613 = vmatmul.mubr.msk.bf16.gmra.mrb[68].mxu1 %vm640_vm2, %v1779_v40  ;;  %v1754_v50 = vmax.f32 %v1658_v43, 0.0 }
 0x473   : > { %v1653_v49 = vadd.f32 %v3061_v14, %v1652_v48  ;;  %v1752_v52 = vmax.f32 %v1650_v45, 0.0 }
 0x474   : > { %v1755_v51 = vmax.f32 %v1661_v46, 0.0 }
 0x475   : > { %v1753_v53 = vmax.f32 %v1653_v49, 0.0 }
 0x476   : > { %v1781_v54 = vpack.c.bf16 %v1755_v51, %v1754_v50 }
 0x477   : > { %v1780_v55 = vpack.c.bf16 %v1753_v53, %v1752_v52  ;;  %v2582_v56 = vpop.f32.mrb[76].mxu0 }
 0x478   : > { %v1674_v57 = vadd.f32 %v2582_v56, %v3061_v14  ;;  %v1665_v59 = vpop.f32.mrb[77].mxu0 }
 0x479   : > { %v1666_v60 = vadd.f32 %v3061_v14, %v1665_v59  ;;  %v2583_v61 = vpop.f32.mrb[78].mxu0  ;;  %2616 = vmatprep.mubr.msk.bf16.mxu1 %vm640_vm2, %v1780_v55 }
 0x47a   : > { %v1677_v62 = vadd.f32 %v2583_v61, %v3061_v14  ;;  %v1668_v63 = vpop.f32.mrb[79].mxu0  ;;  %2617 = vmatmul.mubr.msk.bf16.gmra.mrb[72].mxu1 %vm640_vm2, %v1781_v54  ;;  %v1758_v1 = vmax.f32 %v1674_v57, 0.0 }
 0x47b   : > { %v1669_v0 = vadd.f32 %v3061_v14, %v1668_v63  ;;  %v1756_v3 = vmax.f32 %v1666_v60, 0.0 }
 0x47c   : > { %v1759_v2 = vmax.f32 %v1677_v62, 0.0 }
 0x47d   : > { %v1757_v4 = vmax.f32 %v1669_v0, 0.0  ;;  %v3114_v0 = vld [vmem:[%s3228_s6] ss:$0 sm:$0xff] }
 0x47e   : > { %v1783_v5 = vpack.c.bf16 %v1759_v2, %v1758_v1 }
 0x47f   : > { %v1782_v6 = vpack.c.bf16 %v1757_v4, %v1756_v3  ;;  %v2586_v7 = vpop.f32.mrb[80].mxu0 }
 0x480   : > { %v1690_v8 = vadd.f32 %v2586_v7, %v3061_v14  ;;  %v1681_v9 = vpop.f32.mrb[81].mxu0 }
 0x481   : > { %v1682_v10 = vadd.f32 %v3061_v14, %v1681_v9  ;;  %v2587_v11 = vpop.f32.mrb[82].mxu0  ;;  %2620 = vmatprep.mubr.msk.bf16.mxu1 %vm640_vm2, %v1782_v6 }
 0x482   : > { %v1693_v12 = vadd.f32 %v2587_v11, %v3061_v14  ;;  %v1684_v13 = vpop.f32.mrb[83].mxu0  ;;  %2621 = vmatmul.mubr.msk.bf16.gmra.mrb[76].mxu1 %vm640_vm2, %v1783_v5  ;;  %v1762_v16 = vmax.f32 %v1690_v8, 0.0 }
 0x483   : > { %v1685_v15 = vadd.f32 %v3061_v14, %v1684_v13  ;;  %v1760_v27 = vmax.f32 %v1682_v10, 0.0 }
 0x484   : > { %v1763_v17 = vmax.f32 %v1693_v12, 0.0 }
 0x485   : > { %v1761_v18 = vmax.f32 %v1685_v15, 0.0 }
 0x486   : > { %v1785_v19 = vpack.c.bf16 %v1763_v17, %v1762_v16 }
 0x487   : > { %v1784_v20 = vpack.c.bf16 %v1761_v18, %v1760_v27  ;;  %v2590_v21 = vpop.f32.mrb[84].mxu0 }
 0x488   : > { %v1706_v22 = vadd.f32 %v2590_v21, %v3061_v14  ;;  %v1697_v23 = vpop.f32.mrb[85].mxu0 }
 0x489   : > { %v1698_v24 = vadd.f32 %v3061_v14, %v1697_v23  ;;  %v2591_v25 = vpop.f32.mrb[86].mxu0  ;;  %2624 = vmatprep.mubr.msk.bf16.mxu1 %vm640_vm2, %v1784_v20 }
 0x48a   : > { %v1709_v37 = vadd.f32 %v2591_v25, %v3061_v14  ;;  %v1700_v26 = vpop.f32.mrb[87].mxu0  ;;  %2625 = vmatmul.mubr.msk.bf16.gmra.mrb[80].mxu1 %vm640_vm2, %v1785_v19  ;;  %v1766_v29 = vmax.f32 %v1706_v22, 0.0 }
 0x48b   : > { %v1701_v28 = vadd.f32 %v3061_v14, %v1700_v26  ;;  %v1764_v31 = vmax.f32 %v1698_v24, 0.0 }
 0x48c   : > { %v1767_v30 = vmax.f32 %v1709_v37, 0.0 }
 0x48d   : > { %v1765_v32 = vmax.f32 %v1701_v28, 0.0 }
 0x48e   : > { %v1787_v33 = vpack.c.bf16 %v1767_v30, %v1766_v29 }
 0x48f   : > { %v1786_v34 = vpack.c.bf16 %v1765_v32, %v1764_v31  ;;  %v2594_v35 = vpop.f32.mrb[88].mxu0 }
 0x490   : > { %v1722_v47 = vadd.f32 %v2594_v35, %v3061_v14  ;;  %v1713_v36 = vpop.f32.mrb[89].mxu0 }
 0x491   : > { %v1714_v38 = vadd.f32 %v3061_v14, %v1713_v36  ;;  %v2595_v39 = vpop.f32.mrb[90].mxu0  ;;  %2628 = vmatprep.mubr.msk.bf16.mxu1 %vm640_vm2, %v1786_v34 }
 0x492   : > { %v1725_v40 = vadd.f32 %v2595_v39, %v3061_v14  ;;  %v1716_v41 = vpop.f32.mrb[91].mxu0  ;;  %2629 = vmatmul.mubr.msk.bf16.gmra.mrb[84].mxu1 %vm640_vm2, %v1787_v33  ;;  %v1770_v43 = vmax.f32 %v1722_v47, 0.0 }
 0x493   : > { %v1717_v42 = vadd.f32 %v3061_v14, %v1716_v41  ;;  %v1768_v45 = vmax.f32 %v1714_v38, 0.0 }
 0x494   : > { %v1771_v44 = vmax.f32 %v1725_v40, 0.0 }
 0x495   : > { %v1769_v58 = vmax.f32 %v1717_v42, 0.0 }
 0x496   : > { %v1789_v46 = vpack.c.bf16 %v1771_v44, %v1770_v43 }
 0x497   : > { %v1788_v48 = vpack.c.bf16 %v1769_v58, %v1768_v45  ;;  %v2598_v49 = vpop.f32.mrb[92].mxu0 }
 0x498   : > { %v1738_v50 = vadd.f32 %v2598_v49, %v3061_v14  ;;  %v1729_v51 = vpop.f32.mrb[93].mxu0 }
 0x499   : > { %v1730_v52 = vadd.f32 %v3061_v14, %v1729_v51  ;;  %v2599_v53 = vpop.f32.mrb[94].mxu0  ;;  %2632 = vmatprep.mubr.msk.bf16.mxu1 %vm640_vm2, %v1788_v48 }
 0x49a   : > { %v1741_v54 = vadd.f32 %v2599_v53, %v3061_v14  ;;  %v1732_v55 = vpop.f32.mrb[95].mxu0  ;;  %2633 = vmatmul.mubr.msk.bf16.gmra.mrb[88].mxu1 %vm640_vm2, %v1789_v46  ;;  %v1774_v57 = vmax.f32 %v1738_v50, 0.0 }
 0x49b   : > { %v1733_v56 = vadd.f32 %v3061_v14, %v1732_v55  ;;  %v1772_v60 = vmax.f32 %v1730_v52, 0.0 }
 0x49c   : > { %v1775_v59 = vmax.f32 %v1741_v54, 0.0 }
 0x49d   : > { %v1773_v61 = vmax.f32 %v1733_v56, 0.0 }
 0x49e   : > { %v1791_v62 = vpack.c.bf16 %v1775_v59, %v1774_v57 }
 0x49f   : > { %v1790_v63 = vpack.c.bf16 %v1773_v61, %v1772_v60 }
 0x4a1   : > { %2636 = vmatprep.mubr.msk.bf16.mxu1 %vm640_vm2, %v1790_v63 }
 0x4a2   : > { %2637 = vmatmul.mubr.msk.bf16.gmra.mrb[92].mxu1 %vm640_vm2, %v1791_v62 }
 0x53d   : > { %v2610_v14 = vpop.f32.mrb[64].mxu1 }
 0x53e   : > { %v1922_v1 = vadd.f32 %v2610_v14, %v3114_v0  ;;  %v1913_v2 = vpop.f32.mrb[65].mxu1 }
 0x53f   : > { %v1914_v3 = vadd.f32 %v3114_v0, %v1913_v2  ;;  %v2611_v4 = vpop.f32.mrb[66].mxu1 }
 0x540   : > { %2043 = vst.msk [vmem:[%s3121_s25 + $0x10] sm:$0xff] %vm2040_vm3, %v1922_v1  ;;  %v1925_v5 = vadd.f32 %v2611_v4, %v3114_v0  ;;  %v1916_v6 = vpop.f32.mrb[67].mxu1 }
 0x541   : > { %2041 = vst.msk [vmem:[%s3121_s25] sm:$0xff] %vm2040_vm3, %v1914_v3  ;;  %v1917_v7 = vadd.f32 %v3114_v0, %v1916_v6 }
 0x542   : > { %2044 = vst.msk [vmem:[%s3121_s25 + $0x18] sm:$0xff] %vm2040_vm3, %v1925_v5 }
 0x543   : > { %2042 = vst.msk [vmem:[%s3121_s25 + $0x8] sm:$0xff] %vm2040_vm3, %v1917_v7 }
 0x545   : > { %v2614_v8 = vpop.f32.mrb[68].mxu1 }
 0x546   : > { %v1938_v9 = vadd.f32 %v2614_v8, %v3114_v0  ;;  %v1929_v10 = vpop.f32.mrb[69].mxu1 }
 0x547   : > { %v1930_v11 = vadd.f32 %v3114_v0, %v1929_v10  ;;  %v2615_v12 = vpop.f32.mrb[70].mxu1 }
 0x548   : > { %2047 = vst.msk [vmem:[%s3121_s25 + $0x30] sm:$0xff] %vm2040_vm3, %v1938_v9  ;;  %v1941_v13 = vadd.f32 %v2615_v12, %v3114_v0  ;;  %v1932_v15 = vpop.f32.mrb[71].mxu1 }
 0x549   : > { %2045 = vst.msk [vmem:[%s3121_s25 + $0x20] sm:$0xff] %vm2040_vm3, %v1930_v11  ;;  %v1933_v16 = vadd.f32 %v3114_v0, %v1932_v15 }
 0x54a   : > { %2048 = vst.msk [vmem:[%s3121_s25 + $0x38] sm:$0xff] %vm2040_vm3, %v1941_v13 }
 0x54b   : > { %2046 = vst.msk [vmem:[%s3121_s25 + $0x28] sm:$0xff] %vm2040_vm3, %v1933_v16 }
 0x54d   : > { %v2618_v17 = vpop.f32.mrb[72].mxu1 }
 0x54e   : > { %v1954_v27 = vadd.f32 %v2618_v17, %v3114_v0  ;;  %v1945_v18 = vpop.f32.mrb[73].mxu1 }
 0x54f   : > { %v1946_v19 = vadd.f32 %v3114_v0, %v1945_v18  ;;  %v2619_v20 = vpop.f32.mrb[74].mxu1 }
 0x550   : > { %2051 = vst.msk [vmem:[%s3121_s25 + $0x50] sm:$0xff] %vm2040_vm3, %v1954_v27  ;;  %v1957_v21 = vadd.f32 %v2619_v20, %v3114_v0  ;;  %v1948_v22 = vpop.f32.mrb[75].mxu1 }
 0x551   : > { %2049 = vst.msk [vmem:[%s3121_s25 + $0x40] sm:$0xff] %vm2040_vm3, %v1946_v19  ;;  %v1949_v23 = vadd.f32 %v3114_v0, %v1948_v22 }
 0x552   : > { %2052 = vst.msk [vmem:[%s3121_s25 + $0x58] sm:$0xff] %vm2040_vm3, %v1957_v21 }
 0x553   : > { %2050 = vst.msk [vmem:[%s3121_s25 + $0x48] sm:$0xff] %vm2040_vm3, %v1949_v23 }
 0x555   : > { %v2622_v24 = vpop.f32.mrb[76].mxu1 }
 0x556   : > { %v1970_v25 = vadd.f32 %v2622_v24, %v3114_v0  ;;  %v1961_v37 = vpop.f32.mrb[77].mxu1 }
 0x557   : > { %v1962_v26 = vadd.f32 %v3114_v0, %v1961_v37  ;;  %v2623_v28 = vpop.f32.mrb[78].mxu1 }
 0x558   : > { %2055 = vst.msk [vmem:[%s3121_s25 + $0x70] sm:$0xff] %vm2040_vm3, %v1970_v25  ;;  %v1973_v29 = vadd.f32 %v2623_v28, %v3114_v0  ;;  %v1964_v30 = vpop.f32.mrb[79].mxu1 }
 0x559   : > { %2053 = vst.msk [vmem:[%s3121_s25 + $0x60] sm:$0xff] %vm2040_vm3, %v1962_v26  ;;  %v1965_v31 = vadd.f32 %v3114_v0, %v1964_v30 }
 0x55a   : > { %2056 = vst.msk [vmem:[%s3121_s25 + $0x78] sm:$0xff] %vm2040_vm3, %v1973_v29 }
 0x55b   : > { %2054 = vst.msk [vmem:[%s3121_s25 + $0x68] sm:$0xff] %vm2040_vm3, %v1965_v31 }
 0x55d   : > { %v2626_v32 = vpop.f32.mrb[80].mxu1 }
 0x55e   : > { %v1986_v33 = vadd.f32 %v2626_v32, %v3114_v0  ;;  %v1977_v34 = vpop.f32.mrb[81].mxu1 }
 0x55f   : > { %v1978_v35 = vadd.f32 %v3114_v0, %v1977_v34  ;;  %v2627_v47 = vpop.f32.mrb[82].mxu1 }
 0x560   : > { %2059 = vst.msk [vmem:[%s3121_s25 + $0x90] sm:$0xff] %vm2040_vm3, %v1986_v33  ;;  %v1989_v36 = vadd.f32 %v2627_v47, %v3114_v0  ;;  %v1980_v38 = vpop.f32.mrb[83].mxu1 }
 0x561   : > { %2057 = vst.msk [vmem:[%s3121_s25 + $0x80] sm:$0xff] %vm2040_vm3, %v1978_v35  ;;  %v1981_v39 = vadd.f32 %v3114_v0, %v1980_v38 }
 0x562   : > { %2060 = vst.msk [vmem:[%s3121_s25 + $0x98] sm:$0xff] %vm2040_vm3, %v1989_v36 }
 0x563   : > { %2058 = vst.msk [vmem:[%s3121_s25 + $0x88] sm:$0xff] %vm2040_vm3, %v1981_v39 }
 0x565   : > { %v2630_v40 = vpop.f32.mrb[84].mxu1 }
 0x566   : > { %v2002_v41 = vadd.f32 %v2630_v40, %v3114_v0  ;;  %v1993_v42 = vpop.f32.mrb[85].mxu1 }
 0x567   : > { %v1994_v43 = vadd.f32 %v3114_v0, %v1993_v42  ;;  %v2631_v44 = vpop.f32.mrb[86].mxu1 }
 0x568   : > { %2063 = vst.msk [vmem:[%s3121_s25 + $0xb0] sm:$0xff] %vm2040_vm3, %v2002_v41  ;;  %v2005_v45 = vadd.f32 %v2631_v44, %v3114_v0  ;;  %v1996_v58 = vpop.f32.mrb[87].mxu1 }
 0x569   : > { %2061 = vst.msk [vmem:[%s3121_s25 + $0xa0] sm:$0xff] %vm2040_vm3, %v1994_v43  ;;  %v1997_v46 = vadd.f32 %v3114_v0, %v1996_v58 }
 0x56a   : > { %2064 = vst.msk [vmem:[%s3121_s25 + $0xb8] sm:$0xff] %vm2040_vm3, %v2005_v45 }
 0x56b   : > { %2062 = vst.msk [vmem:[%s3121_s25 + $0xa8] sm:$0xff] %vm2040_vm3, %v1997_v46 }
 0x56d   : > { %v2634_v48 = vpop.f32.mrb[88].mxu1 }
 0x56e   : > { %v2018_v49 = vadd.f32 %v2634_v48, %v3114_v0  ;;  %v2009_v50 = vpop.f32.mrb[89].mxu1 }
 0x56f   : > { %v2010_v51 = vadd.f32 %v3114_v0, %v2009_v50  ;;  %v2635_v52 = vpop.f32.mrb[90].mxu1 }
 0x570   : > { %2067 = vst.msk [vmem:[%s3121_s25 + $0xd0] sm:$0xff] %vm2040_vm3, %v2018_v49  ;;  %v2021_v53 = vadd.f32 %v2635_v52, %v3114_v0  ;;  %v2012_v54 = vpop.f32.mrb[91].mxu1 }
 0x571   : > { %2065 = vst.msk [vmem:[%s3121_s25 + $0xc0] sm:$0xff] %vm2040_vm3, %v2010_v51  ;;  %v2013_v55 = vadd.f32 %v3114_v0, %v2012_v54 }
 0x572   : > { %2068 = vst.msk [vmem:[%s3121_s25 + $0xd8] sm:$0xff] %vm2040_vm3, %v2021_v53 }
 0x573   : > { %2066 = vst.msk [vmem:[%s3121_s25 + $0xc8] sm:$0xff] %vm2040_vm3, %v2013_v55 }
 0x575   : > { %v2638_v56 = vpop.f32.mrb[92].mxu1 }
 0x576   : > { %v2034_v57 = vadd.f32 %v2638_v56, %v3114_v0  ;;  %v2025_v59 = vpop.f32.mrb[93].mxu1 }
 0x577   : > { %v2026_v60 = vadd.f32 %v3114_v0, %v2025_v59  ;;  %v2639_v61 = vpop.f32.mrb[94].mxu1 }
 0x578   : > { %2071 = vst.msk [vmem:[%s3121_s25 + $0xf0] sm:$0xff] %vm2040_vm3, %v2034_v57  ;;  %v2037_v62 = vadd.f32 %v2639_v61, %v3114_v0  ;;  %v2028_v63 = vpop.f32.mrb[95].mxu1 }
 0x579   : > { %2069 = vst.msk [vmem:[%s3121_s25 + $0xe0] sm:$0xff] %vm2040_vm3, %v2026_v60  ;;  %v2029_v14 = vadd.f32 %v3114_v0, %v2028_v63 }
 0x57a   : > { %2072 = vst.msk [vmem:[%s3121_s25 + $0xf8] sm:$0xff] %vm2040_vm3, %v2037_v62 }
 0x57b   : > { %2070 = vst.msk [vmem:[%s3121_s25 + $0xe8] sm:$0xff] %vm2040_vm3, %v2029_v14 }
 0x57c PF: > { %s17_s24 = sadd.s32 1, %s2675_s24  }
 0x57d   : > { %p14_p4 = scmp.ge.s32.totalorder %s17_s24, 6  }
 0x57f   :  { %16 = sbr.rel (!%p14_p4) target bundleno = 1 (0x1), region = 84 }

</bundles_post_ra>
